<compile_context>
chip_gen: v6e
topology: v6e:2x2x1
jax: 0.10.0
libtpu: 0.0.40
codegen_flags: <defaults>
</compile_context>

<pallas_src>
import functools

import numpy as np

import jax
import jax.numpy as jnp
from jax.experimental import pallas as pl
from jax.experimental.pallas import tpu as pltpu


def _const_col(values):
    """(len(values), 1) f32 column built only from splat constants + iota."""
    n = len(values)
    row = jax.lax.broadcasted_iota(jnp.int32, (n, 1), 0)
    col = jnp.full((n, 1), jnp.float32(values[-1]))
    for i in range(n - 1):
        col = jnp.where(row == i, jnp.float32(values[i]), col)
    return col


def _proposal_target_kernel(
    roi_t_ref,   # (4, R) f32 : rows = y1, x1, y2, x2 ; lanes = roi index
    gt_ref,      # (G, 8) f32 : cols 0-3 = box, col 4 = label, cols 5-7 = 0
    out_ref,     # (16, S) f32 : rows 0-3 roi, 4-7 loc, 8 label, 9-15 zero
    *,
    pos_limit,
    pos_iou_thresh,
    neg_iou_thresh_hi,
    neg_iou_thresh_lo,
    loc_mean,
    loc_inv_std,
):
    f32 = jnp.float32
    R = roi_t_ref.shape[1]
    G = gt_ref.shape[0]
    S = out_ref.shape[1]
    eps = f32(jnp.finfo(jnp.float32).eps)

    roi4 = roi_t_ref[...]                                   # (4, R)
    ry1 = roi4[0:1, :]
    rx1 = roi4[1:2, :]
    ry2 = roi4[2:3, :]
    rx2 = roi4[3:4, :]
    gy1 = gt_ref[:, 0:1]
    gx1 = gt_ref[:, 1:2]
    gy2 = gt_ref[:, 2:3]
    gx2 = gt_ref[:, 3:4]
    glabel = gt_ref[:, 4:5]

    # ---- pairwise IoU (G, R), per-roi max + first-occurrence argmax ---------
    ih = jnp.maximum(jnp.minimum(ry2, gy2) - jnp.maximum(ry1, gy1), 0.0)
    iw = jnp.maximum(jnp.minimum(rx2, gx2) - jnp.maximum(rx1, gx1), 0.0)
    inter = ih * iw                                          # (G, R)
    area_r = (ry2 - ry1) * (rx2 - rx1)                       # (1, R)
    area_g = (gy2 - gy1) * (gx2 - gx1)                       # (G, 1)
    union = jnp.maximum(area_r + area_g - inter, eps)
    iou = inter / union                                      # exact f32 divide

    iou_max = jnp.max(iou, axis=0, keepdims=True)            # (1, R)
    g_iota = jax.lax.broadcasted_iota(jnp.int32, (G, R), 0)
    argmax = jnp.min(jnp.where(iou == iou_max, g_iota, jnp.int32(G)),
                     axis=0, keepdims=True)                  # (1, R)
    onehot = (g_iota == argmax).astype(f32)                  # (G, R)

    # matched gt coords / label per roi (exact one-hot reduce over G)
    by1 = jnp.sum(onehot * gy1, axis=0, keepdims=True)
    bx1 = jnp.sum(onehot * gx1, axis=0, keepdims=True)
    by2 = jnp.sum(onehot * gy2, axis=0, keepdims=True)
    bx2 = jnp.sum(onehot * gx2, axis=0, keepdims=True)
    blabel = jnp.sum(onehot * glabel, axis=0, keepdims=True)
    bcoord = jnp.concatenate([by1, bx1, by2, bx2], axis=0)   # (4, R)

    # ---- loc targets on stacked (4,R)/(2,R) operands -------------------------
    # sizes rows: h, w, gh, gw (all eps-guarded -> log() stays finite)
    sizes = jnp.maximum(
        jnp.concatenate([roi4[2:4, :] - roi4[0:2, :],
                         bcoord[2:4, :] - bcoord[0:2, :]], axis=0), eps)
    # centers rows: cy, cx, gcy, gcx
    centers = jnp.concatenate([roi4[0:2, :], bcoord[0:2, :]], axis=0) + 0.5 * sizes
    dyx = (centers[2:4, :] - centers[0:2, :]) / sizes[0:2, :]            # (2, R)
    dhw = jnp.log(sizes[2:4, :] / sizes[0:2, :])                         # (2, R)
    # (x - mean) * inv_std with compile-time constant columns
    loc4 = (jnp.concatenate([dyx, dhw], axis=0)
            - _const_col(loc_mean)) * _const_col(loc_inv_std)            # (4, R)

    # ---- pos/neg masks + exclusive prefix ranks via log2(R) lane scan --------
    pos_b = iou_max >= pos_iou_thresh                                    # (1, R)
    neg_b = (iou_max >= neg_iou_thresh_lo) & (iou_max <= neg_iou_thresh_hi)
    masks = jnp.concatenate([pos_b.astype(f32), neg_b.astype(f32)], axis=0)  # (2, R)

    lane2 = jax.lax.broadcasted_iota(jnp.int32, (2, R), 1)
    incl = masks
    shift = 1
    while shift < R:                        # ceil(log2(R)) unrolled steps
        rolled = pltpu.roll(incl, shift, axis=1)          # rolled[i] = x[i - shift]
        incl = incl + jnp.where(lane2 >= shift, rolled, 0.0)
        shift *= 2
    excl = incl - masks                                    # exclusive prefix counts
    pos_rank = excl[0:1, :]
    neg_rank = excl[1:2, :]

    n_pos_avail = jnp.sum(masks[0:1, :], axis=1, keepdims=True)          # (1, 1)
    n_neg_avail = jnp.sum(masks[1:2, :], axis=1, keepdims=True)          # (1, 1)
    n_pos = jnp.minimum(n_pos_avail, f32(pos_limit))

    # ---- (S, R) one-hot selection: positives first, then negatives -----------
    slot = jax.lax.broadcasted_iota(jnp.int32, (S, 1), 0).astype(f32)    # (S, 1)
    is_pos_col = slot < n_pos                                            # (S, 1)
    neg_tgt = jnp.minimum(jnp.maximum(slot - n_pos, 0.0),
                          jnp.maximum(n_neg_avail - 1.0, 0.0))           # (S, 1)

    pos_hit = ((pos_rank == slot) & pos_b).astype(f32)                   # (S, R)
    neg_hit = ((neg_rank == neg_tgt) & neg_b).astype(f32)                # (S, R)
    lane_r = jax.lax.broadcasted_iota(jnp.int32, (1, R), 1)
    fallback = (lane_r == (R - 1)).astype(f32)                           # (1, R)
    neg_hit = jnp.where(n_neg_avail > 0.0, neg_hit, fallback)
    sel = jnp.where(is_pos_col, pos_hit, neg_hit)                        # (S, R)

    # ---- one lane-dense MXU gather: (16, R) x (S, R)^T -> (16, S) ------------
    # precision=HIGHEST: sel is one-hot but `values` is not bf16-exact, so the
    # gather must run full-f32 MXU passes to keep parity with the reference.
    values = jnp.concatenate(
        [roi4, loc4, blabel + 1.0, jnp.zeros((7, R), f32)], axis=0)      # (16, R)
    res = jax.lax.dot_general(
        values, sel, dimension_numbers=(((1,), (1,)), ((), ())),
        preferred_element_type=f32,
        precision=jax.lax.Precision.HIGHEST)                             # (16, S)

    # zero the label row for background (non-positive) slots; single full store
    row16 = jax.lax.broadcasted_iota(jnp.int32, (16, S), 0)
    s_lane = jax.lax.broadcasted_iota(jnp.int32, (1, S), 1).astype(f32)
    bg = (row16 == 8) & (s_lane >= n_pos)                                # (16, S)
    out_ref[...] = jnp.where(bg, 0.0, res)


def proposal_target_layer(
    roi,
    gt_bbox,
    gt_label,
    n_sample=128,
    pos_ratio=0.25,
    pos_iou_thresh=0.5,
    neg_iou_thresh_hi=0.5,
    neg_iou_thresh_lo=0.0,
    loc_normalize_mean=(0.0, 0.0, 0.0, 0.0),
    loc_normalize_std=(0.1, 0.1, 0.2, 0.2),
):
    roi = roi.astype(jnp.float32)
    gt_bbox = gt_bbox.astype(jnp.float32)
    G = gt_bbox.shape[0]

    # Host prep: rois transposed to (4, R); gt boxes + labels fused into one
    # (G, 8) operand (single input DMA for all gt data).
    roi_all_t = jnp.concatenate([roi, gt_bbox], axis=0).T                # (4, R)
    gt_packed = jnp.concatenate(
        [gt_bbox, gt_label.astype(jnp.float32).reshape(-1, 1),
         jnp.zeros((G, 3), jnp.float32)], axis=1)                        # (G, 8)

    R = roi_all_t.shape[1]
    S = int(n_sample)
    pos_limit = int(round(n_sample * pos_ratio))
    mean = tuple(float(m) for m in loc_normalize_mean)
    inv_std = tuple(1.0 / float(s) for s in loc_normalize_std)

    kernel = functools.partial(
        _proposal_target_kernel,
        pos_limit=pos_limit,
        pos_iou_thresh=float(pos_iou_thresh),
        neg_iou_thresh_hi=float(neg_iou_thresh_hi),
        neg_iou_thresh_lo=float(neg_iou_thresh_lo),
        loc_mean=mean,
        loc_inv_std=inv_std,
    )

    log2_r = max(int(np.ceil(np.log2(max(R, 2)))), 1)
    cost = pl.CostEstimate(
        flops=int(20 * G * R + 2 * 16 * R * S + 6 * log2_r * R + 40 * R),
        transcendentals=int(2 * R),
        bytes_accessed=int(4 * (4 * R + 8 * G + 16 * S)),
    )

    # NOTE: prefix ranks / fixed-size sampling are a global scan over R, so R is
    # NOT tiled (a single block fits easily — no O(R^2) temporaries remain).
    # For throughput / v7x dual-TC, batch images with a leading "parallel" grid
    # axis rather than tiling R.
    out = pl.pallas_call(
        kernel,
        grid=(1,),
        out_shape=jax.ShapeDtypeStruct((16, S), jnp.float32),
        in_specs=[
            pl.BlockSpec((4, R), lambda i: (0, 0)),
            pl.BlockSpec((G, 8), lambda i: (0, 0)),
        ],
        out_specs=pl.BlockSpec((16, S), lambda i: (0, 0)),
        compiler_params=pltpu.CompilerParams(dimension_semantics=("arbitrary",)),
        cost_estimate=cost,
    )(roi_all_t, gt_packed)

    roi_samples = out[0:4, :].T                          # (S, 4)
    loc = out[4:8, :].T                                  # (S, 4)
    labels = (out[8, :] + 0.5).astype(jnp.int32)         # (S,), background = 0
    return roi_samples, loc, labels


# ----------------------------- test harness ---------------------------------
def _make_boxes(key, n, max_origin=60.0, min_size=4.0, max_size=40.0):
    k1, k2 = jax.random.split(key)
    yx1 = jax.random.uniform(k1, (n, 2), minval=0.0, maxval=max_origin)
    hw = jax.random.uniform(k2, (n, 2), minval=min_size, maxval=max_size)
    return jnp.concatenate([yx1, yx1 + hw], axis=1).astype(jnp.float32)


def _reference_proposal_target(roi, gt_bbox, gt_label, n_sample=128, pos_ratio=0.25,
                               pos_iou_thresh=0.5, neg_iou_thresh_hi=0.5,
                               neg_iou_thresh_lo=0.0,
                               loc_normalize_mean=(0.0, 0.0, 0.0, 0.0),
                               loc_normalize_std=(0.1, 0.1, 0.2, 0.2)):
    """Pure numpy reference using the same deterministic sampling as the kernel."""
    eps = np.float32(np.finfo(np.float32).eps)
    roi = np.asarray(roi, np.float32)
    gt_bbox = np.asarray(gt_bbox, np.float32)
    gt_label = np.asarray(gt_label)
    roi_all = np.concatenate([roi, gt_bbox], axis=0)
    R = roi_all.shape[0]
    S = int(n_sample)
    pos_limit = int(round(n_sample * pos_ratio))

    ry1, rx1, ry2, rx2 = roi_all[:, 0], roi_all[:, 1], roi_all[:, 2], roi_all[:, 3]
    gy1, gx1, gy2, gx2 = gt_bbox[:, 0], gt_bbox[:, 1], gt_bbox[:, 2], gt_bbox[:, 3]
    ih = np.maximum(np.minimum(ry2[:, None], gy2[None, :])
                    - np.maximum(ry1[:, None], gy1[None, :]), 0.0)
    iw = np.maximum(np.minimum(rx2[:, None], gx2[None, :])
                    - np.maximum(rx1[:, None], gx1[None, :]), 0.0)
    inter = ih * iw
    area_r = (ry2 - ry1) * (rx2 - rx1)
    area_g = (gy2 - gy1) * (gx2 - gx1)
    union = np.maximum(area_r[:, None] + area_g[None, :] - inter, eps)
    iou = inter / union
    iou_max = iou.max(axis=1)
    amax = iou.argmax(axis=1)

    b = gt_bbox[amax]
    blabel = gt_label[amax].astype(np.int64)

    h = np.maximum(ry2 - ry1, eps)
    w = np.maximum(rx2 - rx1, eps)
    gh = np.maximum(b[:, 2] - b[:, 0], eps)
    gw = np.maximum(b[:, 3] - b[:, 1], eps)
    cy = ry1 + 0.5 * h
    cx = rx1 + 0.5 * w
    gcy = b[:, 0] + 0.5 * gh
    gcx = b[:, 1] + 0.5 * gw
    loc = np.stack([(gcy - cy) / h, (gcx - cx) / w,
                    np.log(gh / h), np.log(gw / w)], axis=1)
    loc = (loc - np.asarray(loc_normalize_mean, np.float32)) / np.asarray(
        loc_normalize_std, np.float32)

    pos_idx = np.nonzero(iou_max >= pos_iou_thresh)[0]
    neg_idx = np.nonzero((iou_max >= neg_iou_thresh_lo)
                         & (iou_max <= neg_iou_thresh_hi))[0]
    n_pos = min(len(pos_idx), pos_limit)
    keep = list(pos_idx[:n_pos])
    for s in range(n_pos, S):
        if len(neg_idx) > 0:
            keep.append(neg_idx[min(s - n_pos, len(neg_idx) - 1)])
        else:
            keep.append(R - 1)
    keep = np.asarray(keep, np.int64)

    roi_samples = roi_all[keep]
    loc_samples = loc[keep]
    labels = blabel[keep] + 1
    labels[n_pos:] = 0
    return (roi_samples.astype(np.float32),
            loc_samples.astype(np.float32),
            labels.astype(np.int32))


if __name__ == "__main__":
    key = jax.random.PRNGKey(0)
    k_roi, k_gt, k_lbl = jax.random.split(key, 3)

    N_ROI, N_GT, N_CLASSES = 120, 8, 20
    roi = _make_boxes(k_roi, N_ROI)                   # (120, 4)
    gt_bbox = _make_boxes(k_gt, N_GT)                 # (8, 4)
    gt_label = jax.random.randint(k_lbl, (N_GT,), 0, N_CLASSES, dtype=jnp.int32)

    fn = jax.jit(proposal_target_layer)
    roi_samples, roi_gt_offset_scale, roi_sample_labels = fn(roi, gt_bbox, gt_label)
    jax.block_until_ready((roi_samples, roi_gt_offset_scale, roi_sample_labels))

    assert roi_samples.shape == (128, 4)
    assert roi_gt_offset_scale.shape == (128, 4)
    assert roi_sample_labels.shape == (128,)
    assert roi_sample_labels.dtype == jnp.int32
    assert bool(jnp.all(jnp.isfinite(roi_samples)))
    assert bool(jnp.all(jnp.isfinite(roi_gt_offset_scale)))

    ref_roi, ref_loc, ref_lbl = _reference_proposal_target(roi, gt_bbox, gt_label)
    np.testing.assert_allclose(np.asarray(roi_samples), ref_roi, rtol=5e-3, atol=5e-2)
    np.testing.assert_allclose(np.asarray(roi_gt_offset_scale), ref_loc,
                               rtol=5e-3, atol=5e-2)
    assert np.array_equal(np.asarray(roi_sample_labels), ref_lbl)

    print("KERNEL_OK")
</pallas_src>

<mosaic_0001>
module attributes {stable_mosaic.version = 11 : i64} {
  func.func @_proposal_target_kernel(%arg0: i32, %arg1: memref<4x128xf32, #tpu.memory_space<vmem>>, %arg2: memref<8x8xf32, #tpu.memory_space<vmem>>, %arg3: memref<16x128xf32, #tpu.memory_space<vmem>>) attributes {dimension_semantics = [#tpu.dimension_semantics<arbitrary>], iteration_bounds = array<i64: 1>, scalar_prefetch = 0 : i64, scratch_operands = 0 : i64, tpu.core_type = #tpu.core_type<tc>, window_params = [{pipeline_mode = #tpu.pipeline_mode<synchronous>, transform_indices = @transform_0, window_bounds = array<i64: 4, 128>}, {pipeline_mode = #tpu.pipeline_mode<synchronous>, transform_indices = @transform_1, window_bounds = array<i64: 8, 8>}, {pipeline_mode = #tpu.pipeline_mode<synchronous>, transform_indices = @transform_2, window_bounds = array<i64: 16, 128>}]} {
    %c0 = arith.constant 0 : index
    %c0_0 = arith.constant 0 : index
    %0 = vector.load %arg1[%c0, %c0_0] : memref<4x128xf32, #tpu.memory_space<vmem>>, vector<4x128xf32>
    %1 = vector.extract_strided_slice %0 {offsets = [0, 0], sizes = [1, 128], strides = [1, 1]} : vector<4x128xf32> to vector<1x128xf32>
    %2 = vector.extract_strided_slice %0 {offsets = [1, 0], sizes = [1, 128], strides = [1, 1]} : vector<4x128xf32> to vector<1x128xf32>
    %3 = vector.extract_strided_slice %0 {offsets = [2, 0], sizes = [1, 128], strides = [1, 1]} : vector<4x128xf32> to vector<1x128xf32>
    %4 = vector.extract_strided_slice %0 {offsets = [3, 0], sizes = [1, 128], strides = [1, 1]} : vector<4x128xf32> to vector<1x128xf32>
    %c0_1 = arith.constant 0 : index
    %c0_2 = arith.constant 0 : index
    %5 = vector.load %arg2[%c0_1, %c0_2] : memref<8x8xf32, #tpu.memory_space<vmem>>, vector<8x1xf32>
    %c0_3 = arith.constant 0 : index
    %c1 = arith.constant 1 : index
    %6 = vector.load %arg2[%c0_3, %c1] : memref<8x8xf32, #tpu.memory_space<vmem>>, vector<8x1xf32>
    %c0_4 = arith.constant 0 : index
    %c2 = arith.constant 2 : index
    %7 = vector.load %arg2[%c0_4, %c2] : memref<8x8xf32, #tpu.memory_space<vmem>>, vector<8x1xf32>
    %c0_5 = arith.constant 0 : index
    %c3 = arith.constant 3 : index
    %8 = vector.load %arg2[%c0_5, %c3] : memref<8x8xf32, #tpu.memory_space<vmem>>, vector<8x1xf32>
    %c0_6 = arith.constant 0 : index
    %c4 = arith.constant 4 : index
    %9 = vector.load %arg2[%c0_6, %c4] : memref<8x8xf32, #tpu.memory_space<vmem>>, vector<8x1xf32>
    %10 = vector.broadcast %3 : vector<1x128xf32> to vector<8x128xf32>
    %11 = vector.broadcast %7 : vector<8x1xf32> to vector<8x128xf32>
    %12 = arith.minimumf %10, %11 : vector<8x128xf32>
    %13 = vector.broadcast %1 : vector<1x128xf32> to vector<8x128xf32>
    %14 = vector.broadcast %5 : vector<8x1xf32> to vector<8x128xf32>
    %15 = arith.maximumf %13, %14 : vector<8x128xf32>
    %16 = arith.subf %12, %15 : vector<8x128xf32>
    %cst = arith.constant 0.000000e+00 : f32
    %17 = vector.broadcast %cst : f32 to vector<8x128xf32>
    %18 = arith.maximumf %16, %17 : vector<8x128xf32>
    %19 = vector.broadcast %4 : vector<1x128xf32> to vector<8x128xf32>
    %20 = vector.broadcast %8 : vector<8x1xf32> to vector<8x128xf32>
    %21 = arith.minimumf %19, %20 : vector<8x128xf32>
    %22 = vector.broadcast %2 : vector<1x128xf32> to vector<8x128xf32>
    %23 = vector.broadcast %6 : vector<8x1xf32> to vector<8x128xf32>
    %24 = arith.maximumf %22, %23 : vector<8x128xf32>
    %25 = arith.subf %21, %24 : vector<8x128xf32>
    %cst_7 = arith.constant 0.000000e+00 : f32
    %26 = vector.broadcast %cst_7 : f32 to vector<8x128xf32>
    %27 = arith.maximumf %25, %26 : vector<8x128xf32>
    %28 = arith.mulf %18, %27 : vector<8x128xf32>
    %29 = arith.subf %3, %1 : vector<1x128xf32>
    %30 = arith.subf %4, %2 : vector<1x128xf32>
    %31 = arith.mulf %29, %30 : vector<1x128xf32>
    %32 = arith.subf %7, %5 : vector<8x1xf32>
    %33 = arith.subf %8, %6 : vector<8x1xf32>
    %34 = arith.mulf %32, %33 : vector<8x1xf32>
    %35 = vector.broadcast %31 : vector<1x128xf32> to vector<8x128xf32>
    %36 = vector.broadcast %34 : vector<8x1xf32> to vector<8x128xf32>
    %37 = arith.addf %35, %36 : vector<8x128xf32>
    %38 = arith.subf %37, %28 : vector<8x128xf32>
    %cst_8 = arith.constant 1.1920929E-7 : f32
    %39 = vector.broadcast %cst_8 : f32 to vector<8x128xf32>
    %40 = arith.maximumf %38, %39 : vector<8x128xf32>
    %41 = arith.divf %28, %40 : vector<8x128xf32>
    %cst_9 = arith.constant dense<0xFF800000> : vector<128xf32>
    %42 = vector.multi_reduction <maximumf>, %41, %cst_9 [0] : vector<8x128xf32> to vector<128xf32>
    %43 = vector.shape_cast %42 : vector<128xf32> to vector<1x128xf32>
    %44 = tpu.iota {dimensions = array<i32: 0>} : vector<8x128xi32>
    %45 = vector.broadcast %43 : vector<1x128xf32> to vector<8x128xf32>
    %46 = arith.cmpf oeq, %41, %45 : vector<8x128xf32>
    %c8_i32 = arith.constant 8 : i32
    %47 = vector.broadcast %c8_i32 : i32 to vector<8x128xi32>
    %48 = arith.select %46, %44, %47 : vector<8x128xi1>, vector<8x128xi32>
    %cst_10 = arith.constant dense<2147483647> : vector<128xi32>
    %49 = vector.multi_reduction <minsi>, %48, %cst_10 [0] : vector<8x128xi32> to vector<128xi32>
    %50 = vector.shape_cast %49 : vector<128xi32> to vector<1x128xi32>
    %51 = vector.broadcast %50 : vector<1x128xi32> to vector<8x128xi32>
    %52 = arith.cmpi eq, %44, %51 : vector<8x128xi32>
    %53 = arith.extui %52 : vector<8x128xi1> to vector<8x128xi32>
    %54 = arith.sitofp %53 : vector<8x128xi32> to vector<8x128xf32>
    %55 = vector.broadcast %5 : vector<8x1xf32> to vector<8x128xf32>
    %56 = arith.mulf %54, %55 : vector<8x128xf32>
    %cst_11 = arith.constant dense<0.000000e+00> : vector<128xf32>
    %57 = vector.multi_reduction <add>, %56, %cst_11 [0] : vector<8x128xf32> to vector<128xf32>
    %58 = vector.shape_cast %57 : vector<128xf32> to vector<1x128xf32>
    %59 = vector.broadcast %6 : vector<8x1xf32> to vector<8x128xf32>
    %60 = arith.mulf %54, %59 : vector<8x128xf32>
    %cst_12 = arith.constant dense<0.000000e+00> : vector<128xf32>
    %61 = vector.multi_reduction <add>, %60, %cst_12 [0] : vector<8x128xf32> to vector<128xf32>
    %62 = vector.shape_cast %61 : vector<128xf32> to vector<1x128xf32>
    %63 = vector.broadcast %7 : vector<8x1xf32> to vector<8x128xf32>
    %64 = arith.mulf %54, %63 : vector<8x128xf32>
    %cst_13 = arith.constant dense<0.000000e+00> : vector<128xf32>
    %65 = vector.multi_reduction <add>, %64, %cst_13 [0] : vector<8x128xf32> to vector<128xf32>
    %66 = vector.shape_cast %65 : vector<128xf32> to vector<1x128xf32>
    %67 = vector.broadcast %8 : vector<8x1xf32> to vector<8x128xf32>
    %68 = arith.mulf %54, %67 : vector<8x128xf32>
    %cst_14 = arith.constant dense<0.000000e+00> : vector<128xf32>
    %69 = vector.multi_reduction <add>, %68, %cst_14 [0] : vector<8x128xf32> to vector<128xf32>
    %70 = vector.shape_cast %69 : vector<128xf32> to vector<1x128xf32>
    %71 = vector.broadcast %9 : vector<8x1xf32> to vector<8x128xf32>
    %72 = arith.mulf %54, %71 : vector<8x128xf32>
    %cst_15 = arith.constant dense<0.000000e+00> : vector<128xf32>
    %73 = vector.multi_reduction <add>, %72, %cst_15 [0] : vector<8x128xf32> to vector<128xf32>
    %74 = vector.shape_cast %73 : vector<128xf32> to vector<1x128xf32>
    %75 = tpu.concatenate %58, %62, %66, %70 in 0 : vector<1x128xf32>, vector<1x128xf32>, vector<1x128xf32>, vector<1x128xf32> -> vector<4x128xf32>
    %76 = vector.extract_strided_slice %0 {offsets = [2, 0], sizes = [2, 128], strides = [1, 1]} : vector<4x128xf32> to vector<2x128xf32>
    %77 = vector.extract_strided_slice %0 {offsets = [0, 0], sizes = [2, 128], strides = [1, 1]} : vector<4x128xf32> to vector<2x128xf32>
    %78 = arith.subf %76, %77 : vector<2x128xf32>
    %79 = vector.extract_strided_slice %75 {offsets = [2, 0], sizes = [2, 128], strides = [1, 1]} : vector<4x128xf32> to vector<2x128xf32>
    %80 = vector.extract_strided_slice %75 {offsets = [0, 0], sizes = [2, 128], strides = [1, 1]} : vector<4x128xf32> to vector<2x128xf32>
    %81 = arith.subf %79, %80 : vector<2x128xf32>
    %82 = tpu.concatenate %78, %81 in 0 : vector<2x128xf32>, vector<2x128xf32> -> vector<4x128xf32>
    %cst_16 = arith.constant 1.1920929E-7 : f32
    %83 = vector.broadcast %cst_16 : f32 to vector<4x128xf32>
    %84 = arith.maximumf %82, %83 : vector<4x128xf32>
    %85 = vector.extract_strided_slice %0 {offsets = [0, 0], sizes = [2, 128], strides = [1, 1]} : vector<4x128xf32> to vector<2x128xf32>
    %86 = vector.extract_strided_slice %75 {offsets = [0, 0], sizes = [2, 128], strides = [1, 1]} : vector<4x128xf32> to vector<2x128xf32>
    %87 = tpu.concatenate %85, %86 in 0 : vector<2x128xf32>, vector<2x128xf32> -> vector<4x128xf32>
    %cst_17 = arith.constant 5.000000e-01 : f32
    %88 = vector.broadcast %cst_17 : f32 to vector<4x128xf32>
    %89 = arith.mulf %88, %84 : vector<4x128xf32>
    %90 = arith.addf %87, %89 : vector<4x128xf32>
    %91 = vector.extract_strided_slice %90 {offsets = [2, 0], sizes = [2, 128], strides = [1, 1]} : vector<4x128xf32> to vector<2x128xf32>
    %92 = vector.extract_strided_slice %90 {offsets = [0, 0], sizes = [2, 128], strides = [1, 1]} : vector<4x128xf32> to vector<2x128xf32>
    %93 = arith.subf %91, %92 : vector<2x128xf32>
    %94 = vector.extract_strided_slice %84 {offsets = [0, 0], sizes = [2, 128], strides = [1, 1]} : vector<4x128xf32> to vector<2x128xf32>
    %95 = arith.divf %93, %94 : vector<2x128xf32>
    %96 = vector.extract_strided_slice %84 {offsets = [2, 0], sizes = [2, 128], strides = [1, 1]} : vector<4x128xf32> to vector<2x128xf32>
    %97 = vector.extract_strided_slice %84 {offsets = [0, 0], sizes = [2, 128], strides = [1, 1]} : vector<4x128xf32> to vector<2x128xf32>
    %98 = arith.divf %96, %97 : vector<2x128xf32>
    %99 = math.log %98 : vector<2x128xf32>
    %100 = tpu.concatenate %95, %99 in 0 : vector<2x128xf32>, vector<2x128xf32> -> vector<4x128xf32>
    %101 = tpu.iota {dimensions = array<i32: 0>} : vector<4x1xi32>
    %cst_18 = arith.constant 0.000000e+00 : f32
    %102 = vector.broadcast %cst_18 : f32 to vector<4x1xf32>
    %c0_i32 = arith.constant 0 : i32
    %103 = vector.broadcast %c0_i32 : i32 to vector<4x1xi32>
    %104 = arith.cmpi eq, %101, %103 : vector<4x1xi32>
    %cst_19 = arith.constant 0.000000e+00 : f32
    %105 = vector.broadcast %cst_19 : f32 to vector<4x1xf32>
    %106 = arith.select %104, %105, %102 : vector<4x1xi1>, vector<4x1xf32>
    %c1_i32 = arith.constant 1 : i32
    %107 = vector.broadcast %c1_i32 : i32 to vector<4x1xi32>
    %108 = arith.cmpi eq, %101, %107 : vector<4x1xi32>
    %cst_20 = arith.constant 0.000000e+00 : f32
    %109 = vector.broadcast %cst_20 : f32 to vector<4x1xf32>
    %110 = arith.select %108, %109, %106 : vector<4x1xi1>, vector<4x1xf32>
    %c2_i32 = arith.constant 2 : i32
    %111 = vector.broadcast %c2_i32 : i32 to vector<4x1xi32>
    %112 = arith.cmpi eq, %101, %111 : vector<4x1xi32>
    %cst_21 = arith.constant 0.000000e+00 : f32
    %113 = vector.broadcast %cst_21 : f32 to vector<4x1xf32>
    %114 = arith.select %112, %113, %110 : vector<4x1xi1>, vector<4x1xf32>
    %115 = vector.broadcast %114 : vector<4x1xf32> to vector<4x128xf32>
    %116 = arith.subf %100, %115 : vector<4x128xf32>
    %117 = tpu.iota {dimensions = array<i32: 0>} : vector<4x1xi32>
    %cst_22 = arith.constant 5.000000e+00 : f32
    %118 = vector.broadcast %cst_22 : f32 to vector<4x1xf32>
    %c0_i32_23 = arith.constant 0 : i32
    %119 = vector.broadcast %c0_i32_23 : i32 to vector<4x1xi32>
    %120 = arith.cmpi eq, %117, %119 : vector<4x1xi32>
    %cst_24 = arith.constant 1.000000e+01 : f32
    %121 = vector.broadcast %cst_24 : f32 to vector<4x1xf32>
    %122 = arith.select %120, %121, %118 : vector<4x1xi1>, vector<4x1xf32>
    %c1_i32_25 = arith.constant 1 : i32
    %123 = vector.broadcast %c1_i32_25 : i32 to vector<4x1xi32>
    %124 = arith.cmpi eq, %117, %123 : vector<4x1xi32>
    %cst_26 = arith.constant 1.000000e+01 : f32
    %125 = vector.broadcast %cst_26 : f32 to vector<4x1xf32>
    %126 = arith.select %124, %125, %122 : vector<4x1xi1>, vector<4x1xf32>
    %c2_i32_27 = arith.constant 2 : i32
    %127 = vector.broadcast %c2_i32_27 : i32 to vector<4x1xi32>
    %128 = arith.cmpi eq, %117, %127 : vector<4x1xi32>
    %cst_28 = arith.constant 5.000000e+00 : f32
    %129 = vector.broadcast %cst_28 : f32 to vector<4x1xf32>
    %130 = arith.select %128, %129, %126 : vector<4x1xi1>, vector<4x1xf32>
    %131 = vector.broadcast %130 : vector<4x1xf32> to vector<4x128xf32>
    %132 = arith.mulf %116, %131 : vector<4x128xf32>
    %cst_29 = arith.constant 5.000000e-01 : f32
    %133 = vector.broadcast %cst_29 : f32 to vector<1x128xf32>
    %134 = arith.cmpf oge, %43, %133 : vector<1x128xf32>
    %cst_30 = arith.constant 0.000000e+00 : f32
    %135 = vector.broadcast %cst_30 : f32 to vector<1x128xf32>
    %136 = arith.cmpf oge, %43, %135 : vector<1x128xf32>
    %cst_31 = arith.constant 5.000000e-01 : f32
    %137 = vector.broadcast %cst_31 : f32 to vector<1x128xf32>
    %138 = arith.cmpf ole, %43, %137 : vector<1x128xf32>
    %139 = arith.andi %136, %138 : vector<1x128xi1>
    %140 = arith.extui %134 : vector<1x128xi1> to vector<1x128xi32>
    %141 = arith.sitofp %140 : vector<1x128xi32> to vector<1x128xf32>
    %142 = arith.extui %139 : vector<1x128xi1> to vector<1x128xi32>
    %143 = arith.sitofp %142 : vector<1x128xi32> to vector<1x128xf32>
    %144 = tpu.concatenate %141, %143 in 0 : vector<1x128xf32>, vector<1x128xf32> -> vector<2x128xf32>
    %145 = tpu.iota {dimensions = array<i32: 1>} : vector<2x128xi32>
    %c1_i32_32 = arith.constant 1 : i32
    %146 = tpu.dynamic_rotate %144 by %c1_i32_32 dim 1 : vector<2x128xf32>, i32 -> vector<2x128xf32>
    %c1_i32_33 = arith.constant 1 : i32
    %147 = vector.broadcast %c1_i32_33 : i32 to vector<2x128xi32>
    %148 = arith.cmpi sge, %145, %147 : vector<2x128xi32>
    %cst_34 = arith.constant 0.000000e+00 : f32
    %149 = vector.broadcast %cst_34 : f32 to vector<2x128xf32>
    %150 = arith.select %148, %146, %149 : vector<2x128xi1>, vector<2x128xf32>
    %151 = arith.addf %144, %150 : vector<2x128xf32>
    %c2_i32_35 = arith.constant 2 : i32
    %152 = tpu.dynamic_rotate %151 by %c2_i32_35 dim 1 : vector<2x128xf32>, i32 -> vector<2x128xf32>
    %c2_i32_36 = arith.constant 2 : i32
    %153 = vector.broadcast %c2_i32_36 : i32 to vector<2x128xi32>
    %154 = arith.cmpi sge, %145, %153 : vector<2x128xi32>
    %cst_37 = arith.constant 0.000000e+00 : f32
    %155 = vector.broadcast %cst_37 : f32 to vector<2x128xf32>
    %156 = arith.select %154, %152, %155 : vector<2x128xi1>, vector<2x128xf32>
    %157 = arith.addf %151, %156 : vector<2x128xf32>
    %c4_i32 = arith.constant 4 : i32
    %158 = tpu.dynamic_rotate %157 by %c4_i32 dim 1 : vector<2x128xf32>, i32 -> vector<2x128xf32>
    %c4_i32_38 = arith.constant 4 : i32
    %159 = vector.broadcast %c4_i32_38 : i32 to vector<2x128xi32>
    %160 = arith.cmpi sge, %145, %159 : vector<2x128xi32>
    %cst_39 = arith.constant 0.000000e+00 : f32
    %161 = vector.broadcast %cst_39 : f32 to vector<2x128xf32>
    %162 = arith.select %160, %158, %161 : vector<2x128xi1>, vector<2x128xf32>
    %163 = arith.addf %157, %162 : vector<2x128xf32>
    %c8_i32_40 = arith.constant 8 : i32
    %164 = tpu.dynamic_rotate %163 by %c8_i32_40 dim 1 : vector<2x128xf32>, i32 -> vector<2x128xf32>
    %c8_i32_41 = arith.constant 8 : i32
    %165 = vector.broadcast %c8_i32_41 : i32 to vector<2x128xi32>
    %166 = arith.cmpi sge, %145, %165 : vector<2x128xi32>
    %cst_42 = arith.constant 0.000000e+00 : f32
    %167 = vector.broadcast %cst_42 : f32 to vector<2x128xf32>
    %168 = arith.select %166, %164, %167 : vector<2x128xi1>, vector<2x128xf32>
    %169 = arith.addf %163, %168 : vector<2x128xf32>
    %c16_i32 = arith.constant 16 : i32
    %170 = tpu.dynamic_rotate %169 by %c16_i32 dim 1 : vector<2x128xf32>, i32 -> vector<2x128xf32>
    %c16_i32_43 = arith.constant 16 : i32
    %171 = vector.broadcast %c16_i32_43 : i32 to vector<2x128xi32>
    %172 = arith.cmpi sge, %145, %171 : vector<2x128xi32>
    %cst_44 = arith.constant 0.000000e+00 : f32
    %173 = vector.broadcast %cst_44 : f32 to vector<2x128xf32>
    %174 = arith.select %172, %170, %173 : vector<2x128xi1>, vector<2x128xf32>
    %175 = arith.addf %169, %174 : vector<2x128xf32>
    %c32_i32 = arith.constant 32 : i32
    %176 = tpu.dynamic_rotate %175 by %c32_i32 dim 1 : vector<2x128xf32>, i32 -> vector<2x128xf32>
    %c32_i32_45 = arith.constant 32 : i32
    %177 = vector.broadcast %c32_i32_45 : i32 to vector<2x128xi32>
    %178 = arith.cmpi sge, %145, %177 : vector<2x128xi32>
    %cst_46 = arith.constant 0.000000e+00 : f32
    %179 = vector.broadcast %cst_46 : f32 to vector<2x128xf32>
    %180 = arith.select %178, %176, %179 : vector<2x128xi1>, vector<2x128xf32>
    %181 = arith.addf %175, %180 : vector<2x128xf32>
    %c64_i32 = arith.constant 64 : i32
    %182 = tpu.dynamic_rotate %181 by %c64_i32 dim 1 : vector<2x128xf32>, i32 -> vector<2x128xf32>
    %c64_i32_47 = arith.constant 64 : i32
    %183 = vector.broadcast %c64_i32_47 : i32 to vector<2x128xi32>
    %184 = arith.cmpi sge, %145, %183 : vector<2x128xi32>
    %cst_48 = arith.constant 0.000000e+00 : f32
    %185 = vector.broadcast %cst_48 : f32 to vector<2x128xf32>
    %186 = arith.select %184, %182, %185 : vector<2x128xi1>, vector<2x128xf32>
    %187 = arith.addf %181, %186 : vector<2x128xf32>
    %188 = arith.subf %187, %144 : vector<2x128xf32>
    %189 = vector.extract_strided_slice %188 {offsets = [0, 0], sizes = [1, 128], strides = [1, 1]} : vector<2x128xf32> to vector<1x128xf32>
    %190 = vector.extract_strided_slice %188 {offsets = [1, 0], sizes = [1, 128], strides = [1, 1]} : vector<2x128xf32> to vector<1x128xf32>
    %191 = vector.extract_strided_slice %144 {offsets = [0, 0], sizes = [1, 128], strides = [1, 1]} : vector<2x128xf32> to vector<1x128xf32>
    %cst_49 = arith.constant dense<0.000000e+00> : vector<1xf32>
    %192 = vector.multi_reduction <add>, %191, %cst_49 [1] : vector<1x128xf32> to vector<1xf32>
    %193 = vector.shape_cast %192 : vector<1xf32> to vector<1x1xf32>
    %194 = vector.extract_strided_slice %144 {offsets = [1, 0], sizes = [1, 128], strides = [1, 1]} : vector<2x128xf32> to vector<1x128xf32>
    %cst_50 = arith.constant dense<0.000000e+00> : vector<1xf32>
    %195 = vector.multi_reduction <add>, %194, %cst_50 [1] : vector<1x128xf32> to vector<1xf32>
    %196 = vector.shape_cast %195 : vector<1xf32> to vector<1x1xf32>
    %cst_51 = arith.constant 3.200000e+01 : f32
    %197 = vector.broadcast %cst_51 : f32 to vector<1x1xf32>
    %198 = arith.minimumf %193, %197 : vector<1x1xf32>
    %199 = tpu.iota {dimensions = array<i32: 0>} : vector<128x1xi32>
    %200 = arith.sitofp %199 : vector<128x1xi32> to vector<128x1xf32>
    %201 = vector.broadcast %198 : vector<1x1xf32> to vector<128x1xf32>
    %202 = arith.cmpf olt, %200, %201 : vector<128x1xf32>
    %203 = vector.broadcast %198 : vector<1x1xf32> to vector<128x1xf32>
    %204 = arith.subf %200, %203 : vector<128x1xf32>
    %cst_52 = arith.constant 0.000000e+00 : f32
    %205 = vector.broadcast %cst_52 : f32 to vector<128x1xf32>
    %206 = arith.maximumf %204, %205 : vector<128x1xf32>
    %cst_53 = arith.constant 1.000000e+00 : f32
    %207 = vector.broadcast %cst_53 : f32 to vector<1x1xf32>
    %208 = arith.subf %196, %207 : vector<1x1xf32>
    %cst_54 = arith.constant 0.000000e+00 : f32
    %209 = vector.broadcast %cst_54 : f32 to vector<1x1xf32>
    %210 = arith.maximumf %208, %209 : vector<1x1xf32>
    %211 = vector.broadcast %210 : vector<1x1xf32> to vector<128x1xf32>
    %212 = arith.minimumf %206, %211 : vector<128x1xf32>
    %213 = vector.broadcast %189 : vector<1x128xf32> to vector<128x128xf32>
    %214 = vector.broadcast %200 : vector<128x1xf32> to vector<128x128xf32>
    %215 = arith.cmpf oeq, %213, %214 : vector<128x128xf32>
    %216 = vector.broadcast %134 : vector<1x128xi1> to vector<128x128xi1>
    %217 = arith.andi %215, %216 : vector<128x128xi1>
    %218 = arith.extui %217 : vector<128x128xi1> to vector<128x128xi32>
    %219 = arith.sitofp %218 : vector<128x128xi32> to vector<128x128xf32>
    %220 = vector.broadcast %190 : vector<1x128xf32> to vector<128x128xf32>
    %221 = vector.broadcast %212 : vector<128x1xf32> to vector<128x128xf32>
    %222 = arith.cmpf oeq, %220, %221 : vector<128x128xf32>
    %223 = vector.broadcast %139 : vector<1x128xi1> to vector<128x128xi1>
    %224 = arith.andi %222, %223 : vector<128x128xi1>
    %225 = arith.extui %224 : vector<128x128xi1> to vector<128x128xi32>
    %226 = arith.sitofp %225 : vector<128x128xi32> to vector<128x128xf32>
    %227 = tpu.iota {dimensions = array<i32: 1>} : vector<1x128xi32>
    %c127_i32 = arith.constant 127 : i32
    %228 = vector.broadcast %c127_i32 : i32 to vector<1x128xi32>
    %229 = arith.cmpi eq, %227, %228 : vector<1x128xi32>
    %230 = arith.extui %229 : vector<1x128xi1> to vector<1x128xi32>
    %231 = arith.sitofp %230 : vector<1x128xi32> to vector<1x128xf32>
    %cst_55 = arith.constant 0.000000e+00 : f32
    %232 = vector.broadcast %cst_55 : f32 to vector<1x1xf32>
    %233 = arith.cmpf ogt, %196, %232 : vector<1x1xf32>
    %234 = vector.shape_cast %233 : vector<1x1xi1> to vector<1x1xi1>
    %235 = vector.broadcast %234 : vector<1x1xi1> to vector<128x128xi1>
    %236 = vector.shape_cast %231 : vector<1x128xf32> to vector<1x128xf32>
    %237 = vector.broadcast %236 : vector<1x128xf32> to vector<128x128xf32>
    %238 = arith.select %235, %226, %237 : vector<128x128xi1>, vector<128x128xf32>
    %239 = vector.shape_cast %202 : vector<128x1xi1> to vector<128x1xi1>
    %240 = vector.broadcast %239 : vector<128x1xi1> to vector<128x128xi1>
    %241 = arith.select %240, %219, %238 : vector<128x128xi1>, vector<128x128xf32>
    %cst_56 = arith.constant 1.000000e+00 : f32
    %242 = vector.broadcast %cst_56 : f32 to vector<1x128xf32>
    %243 = arith.addf %74, %242 : vector<1x128xf32>
    %cst_57 = arith.constant 0.000000e+00 : f32
    %244 = vector.broadcast %cst_57 : f32 to vector<7x128xf32>
    %245 = tpu.concatenate %0, %132, %243, %244 in 0 : vector<4x128xf32>, vector<4x128xf32>, vector<1x128xf32>, vector<7x128xf32> -> vector<16x128xf32>
    %cst_58 = arith.constant dense<0.000000e+00> : vector<16x128xf32>
    %246 = tpu.matmul %245, %241, %cst_58 {dimension_numbers = #tpu.dot_dimension_numbers<[1], [1], [0], [0], [0, 0, 1, 0], [], []>, precision = #tpu.contract_precision<fp32>} : vector<16x128xf32>, vector<128x128xf32>, vector<16x128xf32> -> vector<16x128xf32>
    %247 = tpu.iota {dimensions = array<i32: 0>} : vector<16x128xi32>
    %248 = tpu.iota {dimensions = array<i32: 1>} : vector<1x128xi32>
    %249 = arith.sitofp %248 : vector<1x128xi32> to vector<1x128xf32>
    %c8_i32_59 = arith.constant 8 : i32
    %250 = vector.broadcast %c8_i32_59 : i32 to vector<16x128xi32>
    %251 = arith.cmpi eq, %247, %250 : vector<16x128xi32>
    %252 = vector.broadcast %198 : vector<1x1xf32> to vector<1x128xf32>
    %253 = arith.cmpf oge, %249, %252 : vector<1x128xf32>
    %254 = vector.broadcast %253 : vector<1x128xi1> to vector<16x128xi1>
    %255 = arith.andi %251, %254 : vector<16x128xi1>
    %cst_60 = arith.constant 0.000000e+00 : f32
    %256 = vector.broadcast %cst_60 : f32 to vector<16x128xf32>
    %257 = arith.select %255, %256, %246 : vector<16x128xi1>, vector<16x128xf32>
    %c0_61 = arith.constant 0 : index
    %c0_62 = arith.constant 0 : index
    %258 = vector.load %arg3[%c0_61, %c0_62] : memref<16x128xf32, #tpu.memory_space<vmem>>, vector<16x128xf32>
    tpu.vector_store %arg3[%c0_61, %c0_62], %257 {strides = array<i32>} : memref<16x128xf32, #tpu.memory_space<vmem>>, vector<16x128xf32>,
    return
  }
  func.func @transform_0(%arg0: i32) -> (i32, i32) {
    %c0_i32 = arith.constant 0 : i32
    %c0_i32_0 = arith.constant 0 : i32
    %c0_i32_1 = arith.constant 0 : i32
    return %c0_i32, %c0_i32_0 : i32, i32
  }
  func.func @transform_1(%arg0: i32) -> (i32, i32) {
    %c0_i32 = arith.constant 0 : i32
    %c0_i32_0 = arith.constant 0 : i32
    %c0_i32_1 = arith.constant 0 : i32
    return %c0_i32, %c0_i32_0 : i32, i32
  }
  func.func @transform_2(%arg0: i32) -> (i32, i32) {
    %c0_i32 = arith.constant 0 : i32
    %c0_i32_0 = arith.constant 0 : i32
    %c0_i32_1 = arith.constant 0 : i32
    return %c0_i32, %c0_i32_0 : i32, i32
  }
}

</mosaic_0001>

<bundles_post_ra>
// kernel: proposal_target_layer.1
= control target key start
LH: loop header
LB: loop body
LE: loop exit
PB: predicated region body
PF: predicated region fallthrough
CT: control target
= control target key end

     0   :  { %v1653_v1 = vmov 2   ;;  %v1654_v2 = vmov 3   ;;  %s1655_s11 = smov 2   ;;  %v1656_v3 = vmov 0   ;;  %v1657_v4 = vmov 1   ;;  %s1662_s14 = smov 4   ;;  %s2724_s1 = inlined_call_operand.vmem [shape: f32[8,8], index: 1, kind: input, shape index: {}]   ;;  %s2725_s0 = inlined_call_operand.vmem [shape: f32[4,128], index: 0, kind: input, shape index: {}]   ;;  %s2726_s2 = inlined_call_operand.vmem [shape: f32[16,128], index: 2, kind: output, shape index: {}]  }
   0x1   :  { %v1686_v0 = vld [vmem:[%s2724_s1] sm:$0xff]  ;;  %1640 = vset.pattern.permute.xlu1 %v1653_v1  ;;  %1642 = vset.pattern.permute.xlu0 %v1654_v2  ;;  %s1658_s1 = smov 127   ;;  %v13_v9 = vlaneseq  ;;  %vm2727_vm0 = vcmask 1040384   ;;  %v1659_v52 = vmov 0.0   ;;  %vm149_vm10 = vcmask 1041408   ;;  %s1663_s15 = smov 8  }
   0x2   :  { %63 = vrot.lane.b32.xlu0 %v1686_v0, %s1655_s11  ;;  %19 = vperm.xlu1 %1640, %v1686_v0   ;;  %v1705_v13 = vld [vmem:[%s2725_s0] sm:$0xf]  ;;  %s1660_s0 = smov 1   ;;  %vm151_vm11 = vcmask 1042432   ;;  %vm563_vm15 = vcmask 1043456   ;;  %s1664_s16 = smov 16  }
   0x3   :  { %v1699_v11 = vshrl.u32 %v13_v9, 7  ;;  %v56_v18 = vrot.slane %v1705_v13, 6  ;;  %s1666_s17 = smov 32   ;;  %s1667_s18 = smov 64  }
   0x5   :  { %v15_v12 = vsub.s32 2, %v1699_v11  ;;  %v1708_v15 = vsub.s32 0, %v1699_v11  ;;  %v1711_v16 = vsub.s32 1, %v1699_v11  ;;  %v36_v17 = vsub.s32 3, %v1699_v11 }
   0x6   :  { %1641 = vset.pattern.permute.xlu1 %v1656_v3  ;;  %v1722_v23 = vsub.f32 %v1705_v13, %v56_v18  ;;  %vm180_vm12 = vcmp.eq.s32.totalorder %v1699_v11, 0  ;;  %vm182_vm13 = vcmp.eq.s32.totalorder %v1699_v11, 1  ;;  %vm184_vm14 = vcmp.eq.s32.totalorder %v1699_v11, 2 }
   0x7   :  { %28 = vperm.xlu1 %1641, %v1686_v0   ;;  %v16_v19 = vrot.slane %v1705_v13, %v15_v12  ;;  %v26_v20 = vrot.slane %v1705_v13, %v1708_v15  ;;  %v46_v21 = vrot.slane %v1705_v13, %v1711_v16  ;;  %v37_v22 = vrot.slane %v1705_v13, %v36_v17 }
   0x8   :  { %v60_v30 = vrot.slane %v1722_v23, 1 }
   0xa   :  { %v62_v33 = vmul.f32 %v60_v30, %v1722_v23 }
   0xb   :  { %1643 = vset.pattern.permute.xlu1 %v1657_v4 }
   0xc   :  { %48 = vperm.xlu1 %1643, %v1686_v0   ;;  %v75_v36 = vrot.slane %v62_v33, %v15_v12 }
  0x10   :  { %1644 = vset.pattern.permute.xlu1 %v1653_v1 }
  0x74   :  { %v64_v5 = vpop.permute.xlu0 %63 }
  0x75   :  { %v66_v6 = vsub.f32 %v1686_v0, %v64_v5 }
  0x77   :  { %68 = vrot.lane.b32.xlu0 %v66_v6, %s1658_s1 }
  0x7b   :  { %39 = vperm.xlu0 %1642, %v1686_v0  }
  0x7d   :  { %v1696_v10 = vpop.permute.xlu1 %19 }
  0x7e   :  { %v22_v26 = vmin.f32 %v16_v19, %v1696_v10 }
  0x82   :  { %v29_v14 = vpop.permute.xlu1 %28 }
  0x83   :  { %v31_v27 = vmax.f32 %v26_v20, %v29_v14 }
  0x85   :  { %v32_v31 = vsub.f32 %v22_v26, %v31_v27 }
  0x87   :  { %v49_v24 = vpop.permute.xlu1 %48  ;;  %v33_v34 = vmax.f32 %v32_v31, 0.0 }
  0x88   :  { %v51_v28 = vmax.f32 %v46_v21, %v49_v24 }
  0xe9   :  { %v69_v7 = vpop.permute.xlu0 %68 }
  0xea   :  { %v71_v8 = vmul.f32 %v69_v7, %v66_v6 }
  0xec   :  { %78 = vperm.xlu1 %1644, %v71_v8  }
  0xf6   :  { %v40_v25 = vpop.permute.xlu0 %39 }
  0xf7   :  { %v42_v29 = vmin.f32 %v37_v22, %v40_v25 }
  0xf9   :  { %v52_v32 = vsub.f32 %v42_v29, %v51_v28 }
  0xfb   :  { %v53_v35 = vmax.f32 %v52_v32, 0.0 }
  0xfd   :  { %v54_v38 = vmul.f32 %v53_v35, %v33_v34 }
 0x167   :  { %v79_v37 = vpop.permute.xlu1 %78 }
 0x168   :  { %v81_v39 = vadd.f32 %v79_v37, %v75_v36 }
 0x16a   :  { %v82_v40 = vsub.f32 %v81_v39, %v54_v38 }
 0x16c   :  { %v83_v41 = vmax.f32 %v82_v40, 1.1920929e-07 }
 0x16e   :  { %1647 = vrcp.f32 %v83_v41 }
 0x17b   :  { %v1648_v42 = vpop.eup %1647 }
 0x17c   :  { %v85_v43 = vmul.f32 %v1648_v42, %v54_v38  ;;  %v157_v38 = vrot.slane %v1722_v23, 2  ;;  %v1661_v23 = vmov 5.0  }
 0x17e   :  { %v86_v44 = vrot.slane %v85_v43, 4 }
 0x180   :  { %v87_v45 = vmax.f32 %v85_v43, %v86_v44 }
 0x182   :  { %v88_v46 = vrot.slane %v87_v45, 2 }
 0x184   :  { %v89_v47 = vmax.f32 %v87_v45, %v88_v46 }
 0x186   :  { %v90_v48 = vrot.slane %v89_v47, 1 }
 0x188   :  { %v1727_v49 = vmax.f32 %v89_v47, %v90_v48 }
 0x18a   :  { %vm94_vm1 = vcmp.eq.f32.partialorder %v85_v43, %v1727_v49  ;;  %vm187_vm2 = vcmp.ge.f32.partialorder %v1727_v49, 0.5  ;;  %vm188_vm3 = vcmp.ge.f32.partialorder %v1727_v49, 0.0  ;;  %vm189_vm4 = vcmp.le.f32.partialorder %v1727_v49, 0.5 }
 0x18b   :  { %v95_v50 = vsel %vm94_vm1, %v1699_v11, 8  ;;  %vm1734_vm5 = vmand %vm188_vm3, %vm189_vm4  ;;  %v1271_v53 = vsel %vm187_vm2, 1.0, %v1659_v52 }
 0x18c   :  { %v96_v54 = vrot.slane %v95_v50, 4  ;;  %v1272_v55 = vsel %vm1734_vm5, 1.0, %v1659_v52 }
 0x18d   :  { %v1745_v56 = vsel %vm2727_vm0, %v1271_v53, %v1272_v55  ;;  %v181_v55 = vsel %vm180_vm12, 10.0, %v1661_v23  ;;  %v247_v23 = vadd.s32 48, %v1699_v11 }
 0x18e   :  { %vm97_vm6 = vcmp.lt.s32.totalorder %v95_v50, %v96_v54  ;;  %198 = vrot.lane.b32.xlu0 %v1745_v56, %s1660_s0 }
 0x18f   :  { %v98_v57 = vsel %vm97_vm6, %v95_v50, %v96_v54 }
 0x190   :  { %v99_v58 = vrot.slane %v98_v57, 2 }
 0x192   :  { %vm100_vm7 = vcmp.lt.s32.totalorder %v98_v57, %v99_v58 }
 0x193   :  { %v101_v59 = vsel %vm100_vm7, %v98_v57, %v99_v58  ;;  %v183_v57 = vsel %vm182_vm13, 10.0, %v181_v55 }
 0x194   :  { %v102_v60 = vrot.slane %v101_v59, 1 }
 0x196   :  { %vm103_vm8 = vcmp.lt.s32.totalorder %v101_v59, %v102_v60 }
 0x197   :  { %v104_v61 = vsel %vm103_vm8, %v101_v59, %v102_v60  ;;  %vm237_vm8 = vcmask 1041409  }
 0x198   :  { %vm105_vm9 = vcmp.eq.s32.totalorder %v1699_v11, %v104_v61  ;;  %v185_v61 = vsel %vm184_vm14, 5.0, %v183_v57 }
 0x199   :  { %v1750_v62 = vsel %vm105_vm9, 1.0, %v1659_v52 }
 0x19a   :  { %v129_v63 = vmul.f32 %v1750_v62, %v40_v25  ;;  %v108_v1 = vmul.f32 %v1750_v62, %v29_v14  ;;  %v115_v2 = vmul.f32 %v1750_v62, %v49_v24  ;;  %v122_v4 = vmul.f32 %v1750_v62, %v1696_v10 }
 0x19c   :  { %v109_v5 = vrot.slane %v108_v1, 4  ;;  %v116_v6 = vrot.slane %v115_v2, 4  ;;  %v123_v7 = vrot.slane %v122_v4, 4  ;;  %v130_v8 = vrot.slane %v129_v63, 4 }
 0x19e   :  { %v110_v12 = vadd.f32 %v109_v5, %v108_v1  ;;  %v117_v17 = vadd.f32 %v116_v6, %v115_v2  ;;  %v124_v18 = vadd.f32 %v123_v7, %v122_v4  ;;  %v131_v19 = vadd.f32 %v130_v8, %v129_v63 }
 0x1a0   :  { %v111_v20 = vrot.slane %v110_v12, 2  ;;  %v118_v21 = vrot.slane %v117_v17, 2  ;;  %v125_v22 = vrot.slane %v124_v18, 2  ;;  %v132_v26 = vrot.slane %v131_v19, 2 }
 0x1a2   :  { %v112_v25 = vadd.f32 %v111_v20, %v110_v12  ;;  %v119_v27 = vadd.f32 %v118_v21, %v117_v17  ;;  %v126_v14 = vadd.f32 %v125_v22, %v124_v18  ;;  %v133_v28 = vadd.f32 %v132_v26, %v131_v19 }
 0x1a3   :  { %v1779_v17 = vand.u32 127, %v13_v9 }
 0x1a4   :  { %v113_v24 = vrot.slane %v112_v25, 1  ;;  %v120_v29 = vrot.slane %v119_v27, 1  ;;  %v127_v30 = vrot.slane %v126_v14, 1  ;;  %v134_v10 = vrot.slane %v133_v28, 1 }
 0x1a5   :  { %vm200_vm1 = vcmp.ge.s32.totalorder %v1779_v17, 1  ;;  %vm205_vm3 = vcmp.ge.s32.totalorder %v1779_v17, 2  ;;  %vm210_vm4 = vcmp.ge.s32.totalorder %v1779_v17, 4  ;;  %vm215_vm6 = vcmp.ge.s32.totalorder %v1779_v17, 8 }
 0x1a6   :  { %v114_v31 = vadd.f32 %v113_v24, %v112_v25  ;;  %v121_v32 = vadd.f32 %v120_v29, %v119_v27  ;;  %v128_v33 = vadd.f32 %v127_v30, %v126_v14  ;;  %v135_v34 = vadd.f32 %v134_v10, %v133_v28 }
 0x1a7   :  { %v234_v24 = vsel %vm2727_vm0, %v1745_v56, 0.0  ;;  %v1665_v29 = vmov 4   ;;  %vm220_vm7 = vcmp.ge.s32.totalorder %v1779_v17, 16  ;;  %vm225_vm13 = vcmp.ge.s32.totalorder %v1779_v17, 32 }
 0x1a8   :  { %v148_v35 = vsel %vm2727_vm0, %v114_v31, %v121_v32  ;;  %1645 = vset.pattern.permute.xlu1 %v1665_v29  ;;  %1646 = vset.pattern.permute.xlu0 %v1665_v29  ;;  %v238_v32 = vsel %vm237_vm8, %v1745_v56, 0.0 }
 0x1a9   :  { %v150_v36 = vsel %vm149_vm10, %v148_v35, %v128_v33 }
 0x1aa   :  { %v152_v37 = vsel %vm151_vm11, %v150_v36, %v135_v34  ;;  %v1250_v34 = vcvt.s32.f32 %v1779_v17 }
 0x1ab   :  { %v154_v39 = vrot.slane %v152_v37, 6 }
 0x1ad   :  { %v156_v40 = vsub.f32 %v152_v37, %v154_v39  ;;  %v161_v45 = vsel %vm149_vm10, %v1705_v13, %v154_v39 }
 0x1af   :  { %v159_v41 = vsel %vm149_vm10, %v157_v38, %v156_v40  ;;  %v1796_v38 = vadd.s32 8, %v1699_v11 }
 0x1b0   :  { %v160_v42 = vmax.f32 %v159_v41, 1.1920929e-07 }
 0x1b2   :  { %v169_v43 = vrot.slane %v160_v42, 6  ;;  %v162_v44 = vmul.f32 0.5, %v160_v42 }
 0x1b4   :  { %1649 = vrcp.f32 %v169_v43  ;;  %v163_v46 = vadd.f32 %v162_v44, %v161_v45  ;;  %v255_v43 = vadd.s32 112, %v1699_v11  ;;  %v254_v45 = vadd.s32 104, %v1699_v11 }
 0x1b6   :  { %v165_v47 = vrot.slane %v163_v46, 6 }
 0x1b8   :  { %v167_v48 = vsub.f32 %v163_v46, %v165_v47  ;;  %v253_v46 = vadd.s32 96, %v1699_v11  ;;  %v252_v47 = vadd.s32 88, %v1699_v11 }
 0x1c1   :  { %v1650_v50 = vpop.eup %1649 }
 0x1c2   :  { %v172_v53 = vmul.f32 %v1650_v50, %v167_v48  ;;  %v173_v54 = vmul.f32 %v1650_v50, %v160_v42  ;;  %v256_v42 = vadd.s32 120, %v1699_v11  ;;  %v251_v48 = vadd.s32 80, %v1699_v11 }
 0x1c3   :  { %v250_v50 = vadd.s32 72, %v1699_v11 }
 0x1c4   :  { %1651 = vlog2.f32 %v173_v54  ;;  %v177_v60 = vrot.slane %v172_v53, 2  ;;  %v249_v53 = vadd.s32 64, %v1699_v11  ;;  %v248_v54 = vadd.s32 56, %v1699_v11 }
 0x1d1   :  { %v1652_v58 = vpop.eup %1651 }
 0x1d2   :  { %v175_v59 = vmul.f32 0.6931472, %v1652_v58  ;;  %v1817_v58 = vcvt.s32.f32 %v256_v42 }
 0x1d4   :  { %v179_v63 = vsel %vm149_vm10, %v177_v60, %v175_v59  ;;  %vm1252_vm10 = vcmp.eq.s32.totalorder %v1796_v38, 8  ;;  %v1819_v59 = vcvt.s32.f32 %v255_v43  ;;  %v1821_v60 = vcvt.s32.f32 %v254_v45 }
 0x1d5   :  { %v186_v1 = vmul.f32 %v185_v61, %v179_v63  ;;  %v1823_v61 = vcvt.s32.f32 %v253_v46  ;;  %v246_v63 = vadd.s32 40, %v1699_v11 }
 0x1d7   :  { %v561_v2 = vrot.slane %v186_v1, 4  ;;  %v245_v1 = vadd.s32 32, %v1699_v11 }
 0x1d9   :  { %v564_v4 = vsel %vm563_vm15, %v1705_v13, %v561_v2  ;;  %v1827_v2 = vcvt.s32.f32 %v252_v47  ;;  %vm230_vm15 = vcmp.ge.s32.totalorder %v1779_v17, 64 }
 0x1da   :  { %v1768_v5 = vand.u32 4294901760, %v564_v4 }
 0x1dc   :  { %1482 = vmatprep.mubr.f32.mxu1 %v1768_v5  ;;  %v1772_v6 = vsub.f32 %v564_v4, %v1768_v5  ;;  %v1829_v4 = vcvt.s32.f32 %v251_v48 }
 0x1de   :  { %v2728_v7 = vand.u32 4294901760, %v1772_v6 }
 0x1e0   :  { %v650_v8 = vsub.f32 %v1772_v6, %v2728_v7 }
 0x1e2   :  { %v651_v12 = vand.u32 4294901760, %v650_v8  ;;  %v1831_v8 = vcvt.s32.f32 %v250_v50 }
 0x1e4   :  { %1447 = vmatprep.mubr.f32.mxu0 %v651_v12  ;;  %v244_v12 = vadd.s32 24, %v1699_v11 }
 0x200   :  { %v199_v13 = vpop.permute.xlu0 %198 }
 0x201   :  { %v201_v18 = vsel %vm200_vm1, %v199_v13, 0.0  ;;  %v1834_v13 = vcvt.s32.f32 %v249_v53 }
 0x202   :  { %v202_v19 = vadd.f32 %v201_v18, %v1745_v56  ;;  %v1836_v18 = vcvt.s32.f32 %v248_v54 }
 0x204   :  { %203 = vrot.lane.b32.xlu1 %v202_v19, %s1655_s11 }
 0x276   :  { %v204_v20 = vpop.permute.xlu1 %203 }
 0x277   :  { %v206_v21 = vsel %vm205_vm3, %v204_v20, 0.0  ;;  %v243_v20 = vadd.s32 16, %v1699_v11  ;;  %vm485_vm3 = vcmp.eq.s32.totalorder %v1779_v17, 127 }
 0x278   :  { %v207_v22 = vadd.f32 %v206_v21, %v202_v19  ;;  %v1838_v19 = vcvt.s32.f32 %v247_v23  ;;  %v1895_v54 = vsel %vm485_vm3, 1.0, %v1659_v52 }
 0x27a   :  { %208 = vrot.lane.b32.xlu0 %v207_v22, %s1662_s14 }
 0x2ec   :  { %v209_v26 = vpop.permute.xlu0 %208 }
 0x2ed   :  { %v211_v9 = vsel %vm210_vm4, %v209_v26, 0.0 }
 0x2ee   :  { %v212_v25 = vadd.f32 %v211_v9, %v207_v22 }
 0x2f0   :  { %213 = vrot.lane.b32.xlu1 %v212_v25, %s1663_s15 }
 0x362   :  { %v214_v27 = vpop.permute.xlu1 %213 }
 0x363   :  { %v216_v14 = vsel %vm215_vm6, %v214_v27, 0.0  ;;  %v1850_v27 = vcvt.s32.f32 %v245_v1 }
 0x364   :  { %v217_v28 = vadd.f32 %v216_v14, %v212_v25  ;;  %v1848_v25 = vcvt.s32.f32 %v246_v63 }
 0x366   :  { %218 = vrot.lane.b32.xlu0 %v217_v28, %s1664_s16 }
 0x385   :  { %235 = vadd.xlane.f32.xlu0 %v234_v24 }
 0x3d8   :  { %v219_v30 = vpop.permute.xlu0 %218 }
 0x3d9   :  { %v221_v10 = vsel %vm220_vm7, %v219_v30, 0.0  ;;  %v1858_v30 = vcvt.s32.f32 %v244_v12 }
 0x3da   :  { %v222_v31 = vadd.f32 %v221_v10, %v217_v28 }
 0x3dc   :  { %223 = vrot.lane.b32.xlu1 %v222_v31, %s1666_s17 }
 0x400   :  { %239 = vadd.xlane.f32.xlu1 %v238_v32 }
 0x40e   :  { %v236_v33 = vpop.xlane.xlu0 %235 }
 0x40f   :  { %v241_v35 = vmin.f32 %v236_v33, 32.0 }
 0x411   :  { %137 = vperm.xlu1 %1645, %v1686_v0   ;;  %vm1253_vm9 = vcmp.ge.f32.partialorder %v1250_v34, %v241_v35  ;;  %v1815_v55 = vrot.slane %v241_v35, %v1708_v15 }
 0x412   :  { %v1254_v36 = vsel %vm1253_vm9, 1, %v1656_v3 }
 0x413   :  { %v1258_v37 = vrot.slane %v1254_v36, %v1708_v15  ;;  %v308_v22 = vsub.f32 %v1817_v58, %v1815_v55  ;;  %v307_v26 = vsub.f32 %v1819_v59, %v1815_v55  ;;  %v306_v9 = vsub.f32 %v1821_v60, %v1815_v55 }
 0x414   :  { %v305_v28 = vsub.f32 %v1823_v61, %v1815_v55  ;;  %v304_v24 = vsub.f32 %v1827_v2, %v1815_v55  ;;  %v303_v29 = vsub.f32 %v1829_v4, %v1815_v55  ;;  %v302_v32 = vsub.f32 %v1831_v8, %v1815_v55 }
 0x415   :  { %vm1259_vm11 = vcmp.eq.s32.totalorder %v1258_v37, 1  ;;  %v301_v33 = vsub.f32 %v1834_v13, %v1815_v55  ;;  %v324_v36 = vmax.f32 %v308_v22, 0.0  ;;  %v1868_v37 = vcvt.s32.f32 %v243_v20 }
 0x416   :  { %vm1799_vm12 = vmand %vm1252_vm10, %vm1259_vm11  ;;  %v300_v42 = vsub.f32 %v1836_v18, %v1815_v55  ;;  %vm292_vm1 = vcmp.lt.f32.partialorder %v1817_v58, %v1815_v55  ;;  %v320_v45 = vmax.f32 %v304_v24, 0.0  ;;  %v319_v46 = vmax.f32 %v303_v29, 0.0 }
 0x417   :  { %v1879_v47 = vmax.f32 %v302_v32, 0.0  ;;  %v1881_v48 = vmax.f32 %v301_v33, 0.0  ;;  %vm291_vm4 = vcmp.lt.f32.partialorder %v1819_v59, %v1815_v55  ;;  %v298_v17 = vsub.f32 %v1848_v25, %v1815_v55 }
 0x418   :  { %vm290_vm10 = vcmp.lt.f32.partialorder %v1821_v60, %v1815_v55  ;;  %vm288_vm0 = vcmp.lt.f32.partialorder %v1827_v2, %v1815_v55 }
 0x44e   :  { %v224_v40 = vpop.permute.xlu1 %223 }
 0x44f   :  { %v226_v41 = vsel %vm225_vm13, %v224_v40, 0.0  ;;  %v323_v40 = vmax.f32 %v307_v26, 0.0 }
 0x450   :  { %v227_v0 = vadd.f32 %v226_v41, %v222_v31  ;;  %v322_v41 = vmax.f32 %v306_v9, 0.0 }
 0x452   :  { %228 = vrot.lane.b32.xlu0 %v227_v0, %s1667_s18 }
 0x489   :  { %v240_v44 = vpop.xlane.xlu1 %239 }
 0x48a   :  { %v1273_v57 = vadd.f32 -1.0, %v240_v44  ;;  %vm488_vm14 = vcmp.gt.f32.partialorder %v240_v44, 0.0 }
 0x48b   :  { %v489_v10 = vsel %vm488_vm14, 1, %v1656_v3  ;;  %v299_v3 = vsub.f32 %v1838_v19, %v1815_v55 }
 0x48c   :  { %v326_v21 = vmax.f32 %v1273_v57, 0.0  ;;  %v493_v43 = vrot.slane %v489_v10, %v1711_v16  ;;  %v1898_v57 = vmax.f32 %v300_v42, 0.0 }
 0x48e   :  { %v1866_v34 = vrot.slane %v326_v21, %v1711_v16  ;;  %vm1902_vm6 = vcmp.eq.s32.totalorder %v493_v43, 1 }
 0x490   :  { %v345_v23 = vmin.f32 %v323_v40, %v1866_v34  ;;  %v344_v1 = vmin.f32 %v322_v41, %v1866_v34  ;;  %v342_v20 = vmin.f32 %v320_v45, %v1866_v34  ;;  %v341_v22 = vmin.f32 %v319_v46, %v1866_v34 }
 0x491   :  { %v340_v26 = vmin.f32 %v1879_v47, %v1866_v34  ;;  %v338_v24 = vmin.f32 %v1898_v57, %v1866_v34 }
 0x4c4   :  { %v229_v14 = vpop.permute.xlu0 %228 }
 0x4c5   :  { %v231_v31 = vsel %vm230_vm15, %v229_v14, 0.0 }
 0x4c6   :  { %v232_v35 = vadd.f32 %v231_v31, %v227_v0  ;;  %v321_v0 = vmax.f32 %v305_v28, 0.0  ;;  %v339_v28 = vmin.f32 %v1881_v48, %v1866_v34 }
 0x4c8   :  { %v233_v44 = vsub.f32 %v232_v35, %v1745_v56  ;;  %v346_v56 = vmin.f32 %v324_v36, %v1866_v34  ;;  %v343_v12 = vmin.f32 %v321_v0, %v1866_v34 }
 0x4ca   :  { %v1884_v50 = vrot.slane %v233_v44, %v1708_v15  ;;  %v1887_v53 = vrot.slane %v233_v44, %v1711_v16  ;;  %v1900_v15 = vmax.f32 %v299_v3, 0.0 }
 0x4cc   :  { %vm366_vm7 = vcmp.eq.f32.partialorder %v1884_v50, %v1817_v58  ;;  %vm435_vm8 = vcmp.eq.f32.partialorder %v1887_v53, %v346_v56  ;;  %vm365_vm9 = vcmp.eq.f32.partialorder %v1884_v50, %v1819_v59  ;;  %vm1916_vm13 = vcmp.eq.f32.partialorder %v1887_v53, %v345_v23 }
 0x4cd   :  { %vm383_vm11 = vmand %vm366_vm7, %vm187_vm2  ;;  %vm364_vm15 = vcmp.eq.f32.partialorder %v1884_v50, %v1821_v60  ;;  %vm1976_vm3 = vcmp.eq.f32.partialorder %v1887_v53, %v342_v20  ;;  %v297_v20 = vsub.f32 %v1850_v27, %v1815_v55 }
 0x4ce   :  { %v1289_v21 = vsel %vm383_vm11, 1.0, %v1659_v52  ;;  %vm452_vm14 = vmand %vm435_vm8, %vm1734_vm5  ;;  %vm1937_vm11 = vcmp.eq.f32.partialorder %v1887_v53, %v344_v1 }
 0x4cf   :  { %v1305_v9 = vsel %vm452_vm14, 1.0, %v1659_v52  ;;  %vm382_vm7 = vmand %vm365_vm9, %vm187_vm2  ;;  %vm363_vm9 = vcmp.eq.f32.partialorder %v1884_v50, %v1823_v61  ;;  %vm1956_vm14 = vcmp.eq.f32.partialorder %v1887_v53, %v343_v12 }
 0x4d0   :  { %v510_v29 = vsel %vm1902_vm6, %v1305_v9, %v1895_v54  ;;  %v1288_v10 = vsel %vm382_vm7, 1.0, %v1659_v52  ;;  %vm451_vm8 = vmand %vm1916_vm13, %vm1734_vm5  ;;  %vm362_vm7 = vcmp.eq.f32.partialorder %v1884_v50, %v1827_v2  ;;  %v138_v9 = vpop.permute.xlu1 %137 }
 0x4d1   :  { %v1965_v32 = vsel %vm292_vm1, %v1289_v21, %v510_v29  ;;  %v1304_v33 = vsel %vm451_vm8, 1.0, %v1659_v52  ;;  %vm381_vm13 = vmand %vm364_vm15, %vm187_vm2  ;;  %vm361_vm8 = vcmp.eq.f32.partialorder %v1884_v50, %v1829_v4  ;;  %vm360_vm15 = vcmp.eq.f32.partialorder %v1884_v50, %v1831_v8 }
 0x4d2   :  { %1415 = vmatprep.subr.mxu0 %v1965_v32  ;;  %v509_v58 = vsel %vm1902_vm6, %v1304_v33, %v1895_v54  ;;  %v1287_v36 = vsel %vm381_vm13, 1.0, %v1659_v52  ;;  %vm450_vm1 = vmand %vm1937_vm11, %vm1734_vm5  ;;  %v1991_v40 = vsub.f32 %v1965_v32, %v1965_v32  ;;  %vm2010_vm13 = vcmp.eq.f32.partialorder %v1887_v53, %v341_v22 }
 0x4d3   :  { %1416 = vmatpush3.xpose.msra.mxu0 %v1965_v32  ;;  %v2001_v41 = vsel %vm291_vm4, %v1288_v10, %v509_v58  ;;  %v1303_v42 = vsel %vm450_vm1, 1.0, %v1659_v52  ;;  %vm380_vm11 = vmand %vm363_vm9, %vm187_vm2  ;;  %vm2044_vm1 = vcmp.eq.f32.partialorder %v1887_v53, %v340_v26 }
 0x4d4   :  { %1417 = vmatprep.subr.mxu0 %v2001_v41  ;;  %v508_v59 = vsel %vm1902_vm6, %v1303_v42, %v1895_v54  ;;  %v2021_v43 = vand.u32 4294901760, %v1991_v40  ;;  %v1286_v44 = vsel %vm380_vm11, 1.0, %v1659_v52  ;;  %vm449_vm4 = vmand %vm1956_vm14, %vm1734_vm5  ;;  %v2030_v0 = vsub.f32 %v2001_v41, %v2001_v41 }
 0x4d5   :  { %v2035_v45 = vsel %vm290_vm10, %v1287_v36, %v508_v59  ;;  %v1302_v46 = vsel %vm449_vm4, 1.0, %v1659_v52  ;;  %vm379_vm9 = vmand %vm362_vm7, %vm187_vm2  ;;  %vm359_vm14 = vcmp.eq.f32.partialorder %v1884_v50, %v1834_v13  ;;  %vm2747_vm7 = vcmp.lt.f32.partialorder %v1823_v61, %v1815_v55 }
 0x4d6   :  { %v671_v60 = vsub.f32 %v1991_v40, %v2021_v43  ;;  %v507_v48 = vsel %vm1902_vm6, %v1302_v46, %v1895_v54  ;;  %v2056_v56 = vand.u32 4294901760, %v2030_v0  ;;  %v1285_v23 = vsel %vm379_vm9, 1.0, %v1659_v52  ;;  %vm448_vm10 = vmand %vm1976_vm3, %vm1734_vm5 }
 0x4d7   :  { %1418 = vmatpush3.xpose.msra.mxu0 %v2001_v41  ;;  %v2067_v63 = vsel %vm2747_vm7, %v1286_v44, %v507_v48  ;;  %v1301_v1 = vsel %vm448_vm10, 1.0, %v1659_v52  ;;  %v2072_v12 = vsub.f32 %v2035_v45, %v2035_v45  ;;  %vm378_vm11 = vmand %vm361_vm8, %vm187_vm2  ;;  %vm2080_vm3 = vcmp.eq.f32.partialorder %v1887_v53, %v339_v28 }
 0x4d8   :  { %1419 = vmatprep.subr.mxu0 %v2035_v45  ;;  %v672_v61 = vand.u32 4294901760, %v671_v60  ;;  %v678_v21 = vsub.f32 %v2030_v0, %v2056_v56  ;;  %v506_v22 = vsel %vm1902_vm6, %v1301_v1, %v1895_v54  ;;  %v1284_v26 = vsel %vm378_vm11, 1.0, %v1659_v52  ;;  %vm447_vm8 = vmand %vm2010_vm13, %vm1734_vm5 }
 0x4d9   :  { %v2098_v14 = vsel %vm288_vm0, %v1285_v23, %v506_v22  ;;  %v2101_v28 = vand.u32 4294901760, %v2072_v12  ;;  %v1300_v29 = vsel %vm447_vm8, 1.0, %v1659_v52  ;;  %v2106_v10 = vsub.f32 %v2067_v63, %v2067_v63  ;;  %vm2113_vm13 = vmand %vm360_vm15, %vm187_vm2 }
 0x4da   :  { %1450 = vmatprep.subr.mxu1 %v672_v61  ;;  %v679_v2 = vand.u32 4294901760, %v678_v21  ;;  %v505_v33 = vsel %vm1902_vm6, %v1300_v29, %v1895_v54  ;;  %vm446_vm0 = vmand %vm2044_vm1, %vm1734_vm5  ;;  %v2126_v35 = vsub.f32 %v2098_v14, %v2098_v14  ;;  %vm2132_vm15 = vcmp.eq.f32.partialorder %v1887_v53, %v338_v24 }
 0x4db   :  { %1420 = vmatpush3.xpose.msra.mxu0 %v2035_v45  ;;  %1451 = vmatpush3.xpose.msra.mxu1 %v672_v61  ;;  %v685_v36 = vsub.f32 %v2072_v12, %v2101_v28  ;;  %vm2754_vm4 = vcmp.lt.f32.partialorder %v1829_v4, %v1815_v55  ;;  %v2145_v3 = vand.u32 4294901760, %v2106_v10  ;;  %v1299_v57 = vsel %vm446_vm0, 1.0, %v1659_v52  ;;  %vm445_vm9 = vmand %vm2080_vm3, %vm1734_vm5 }
 0x4dc   :  { %v2142_v42 = vsel %vm2754_vm4, %v1284_v26, %v505_v33  ;;  %v140_v24 = vmul.f32 %v1750_v62, %v138_v9  ;;  %1421 = vmatprep.subr.mxu0 %v2067_v63  ;;  %1452 = vmatprep.subr.mxu1 %v679_v2  ;;  %v1283_v59 = vsel %vm2113_vm13, 1.0, %v1659_v52  ;;  %v504_v4 = vsel %vm1902_vm6, %v1299_v57, %v1895_v54  ;;  %vm2169_vm10 = vmand %vm359_vm14, %vm187_vm2 }
 0x4dd   :  { %v337_v44 = vmin.f32 %v1900_v15, %v1866_v34  ;;  %vm286_vm1 = vcmp.lt.f32.partialorder %v1831_v8, %v1815_v55  ;;  %v1298_v46 = vsel %vm445_vm9, 1.0, %v1659_v52  ;;  %v2176_v47 = vsub.f32 %v2142_v42, %v2142_v42  ;;  %vm444_vm14 = vmand %vm2132_vm15, %vm1734_vm5 }
 0x4de   :  { %vm358_vm7 = vcmp.eq.f32.partialorder %v1884_v50, %v1836_v18  ;;  %v686_v15 = vand.u32 4294901760, %v685_v36  ;;  %v692_v8 = vsub.f32 %v2106_v10, %v2145_v3  ;;  %v2183_v60 = vand.u32 4294901760, %v2126_v35 }
 0x4df   :  { %vm2190_vm11 = vcmp.eq.f32.partialorder %v1887_v53, %v337_v44  ;;  %1422 = vmatpush3.xpose.msra.mxu0 %v2067_v63  ;;  %1453 = vmatpush3.xpose.msra.mxu1 %v679_v2  ;;  %v2195_v23 = vsel %vm286_vm1, %v1283_v59, %v504_v4  ;;  %v314_v1 = vmax.f32 %v298_v17, 0.0  ;;  %v2203_v61 = vcvt.s32.f32 %v1796_v38  ;;  %vm2217_vm3 = vmand %vm358_vm7, %vm187_vm2 }
 0x4e0   :  { %v141_v21 = vrot.slane %v140_v24, 4  ;;  %1423 = vmatprep.subr.mxu0 %v2098_v14  ;;  %1454 = vmatprep.subr.mxu1 %v686_v15  ;;  %v1282_v22 = vsel %vm2169_vm10, 1.0, %v1659_v52  ;;  %v503_v26 = vsel %vm1902_vm6, %v1298_v46, %v1895_v54  ;;  %v296_v17 = vsub.f32 %v1858_v30, %v1815_v55  ;;  %vm443_vm13 = vmand %vm2190_vm11, %vm1734_vm5 }
 0x4e1   :  { %v2224_v9 = vand.u32 4294901760, %v2176_v47  ;;  %v1297_v29 = vsel %vm444_vm14, 1.0, %v1659_v52  ;;  %vm357_vm8 = vcmp.eq.f32.partialorder %v1884_v50, %v1838_v19  ;;  %v336_v31 = vmin.f32 %v314_v1, %v1866_v34 }
 0x4e2   :  { %v693_v2 = vand.u32 4294901760, %v692_v8  ;;  %v699_v33 = vsub.f32 %v2126_v35, %v2183_v60  ;;  %vm285_vm0 = vcmp.lt.f32.partialorder %v1834_v13, %v1815_v55  ;;  %v2245_v58 = vsub.f32 %v2195_v23, %v2195_v23  ;;  %vm374_vm9 = vmand %vm357_vm8, %vm187_vm2 }
 0x4e3   :  { %1424 = vmatpush3.xpose.msra.mxu0 %v2098_v14  ;;  %1455 = vmatpush3.xpose.msra.mxu1 %v686_v15  ;;  %v2248_v36 = vsel %vm285_vm0, %v1282_v22, %v503_v26  ;;  %vm284_vm15 = vcmp.lt.f32.partialorder %v1836_v18, %v1815_v55  ;;  %vm2253_vm4 = vcmp.eq.f32.partialorder %v1887_v53, %v336_v31  ;;  %v313_v59 = vmax.f32 %v297_v20, 0.0 }
 0x4e4   :  { %1425 = vmatprep.subr.mxu0 %v2142_v42  ;;  %1456 = vmatprep.subr.mxu1 %v693_v2  ;;  %v1281_v13 = vsel %vm2217_vm3, 1.0, %v1659_v52  ;;  %v502_v4 = vsel %vm1902_vm6, %v1297_v29, %v1895_v54  ;;  %v1296_v44 = vsel %vm443_vm13, 1.0, %v1659_v52  ;;  %v295_v62 = vsub.f32 %v1868_v37, %v1815_v55  ;;  %vm442_vm10 = vmand %vm2253_vm4, %vm1734_vm5 }
 0x4e5   :  { %v142_v46 = vadd.f32 %v141_v21, %v140_v24  ;;  %v706_v15 = vsub.f32 %v2176_v47, %v2224_v9  ;;  %v335_v8 = vmin.f32 %v313_v59, %v1866_v34  ;;  %v312_v1 = vmax.f32 %v296_v17, 0.0 }
 0x4e6   :  { %v700_v20 = vand.u32 4294901760, %v699_v33  ;;  %v2281_v22 = vand.u32 4294901760, %v2245_v58  ;;  %v2285_v48 = vsub.f32 %v2248_v36, %v2248_v36  ;;  %vm356_vm1 = vcmp.eq.f32.partialorder %v1884_v50, %v1848_v25 }
 0x4e7   :  { %1426 = vmatpush3.xpose.msra.mxu0 %v2142_v42  ;;  %1457 = vmatpush3.xpose.msra.mxu1 %v693_v2  ;;  %v2297_v24 = vsel %vm284_vm15, %v1281_v13, %v502_v4  ;;  %v1280_v21 = vsel %vm374_vm9, 1.0, %v1659_v52  ;;  %v501_v26 = vsel %vm1902_vm6, %v1296_v44, %v1895_v54  ;;  %vm2304_vm7 = vcmp.eq.f32.partialorder %v1887_v53, %v335_v8  ;;  %vm2314_vm11 = vmand %vm356_vm1, %vm187_vm2 }
 0x4e8   :  { %1427 = vmatprep.subr.mxu0 %v2195_v23  ;;  %1458 = vmatprep.subr.mxu1 %v700_v20  ;;  %vm283_vm14 = vcmp.lt.f32.partialorder %v1838_v19, %v1815_v55  ;;  %v334_v18 = vmin.f32 %v312_v1, %v1866_v34  ;;  %v143_v17 = vrot.slane %v142_v46, 2  ;;  %v707_v29 = vand.u32 4294901760, %v706_v15  ;;  %vm441_vm8 = vmand %vm2304_vm7, %vm1734_vm5 }
 0x4e9   :  { %v1295_v2 = vsel %vm442_vm10, 1.0, %v1659_v52  ;;  %vm355_vm3 = vcmp.eq.f32.partialorder %v1884_v50, %v1850_v27  ;;  %v713_v33 = vsub.f32 %v2245_v58, %v2281_v22  ;;  %v2323_v57 = vsel %vm283_vm14, %v1280_v21, %v501_v26 }
 0x4ea   :  { %v2326_v19 = vand.u32 4294901760, %v2285_v48  ;;  %v2330_v59 = vsub.f32 %v2297_v24, %v2297_v24  ;;  %vm2338_vm13 = vcmp.eq.f32.partialorder %v1887_v53, %v334_v18  ;;  %v311_v4 = vmax.f32 %v295_v62, 0.0  ;;  %vm2361_vm15 = vmand %vm355_vm3, %vm187_vm2 }
 0x4eb   :  { %1428 = vmatpush3.xpose.msra.mxu0 %v2195_v23  ;;  %1459 = vmatpush3.xpose.msra.mxu1 %v700_v20  ;;  %v294_v44 = vsub.f32 %v2203_v61, %v1815_v55  ;;  %v2345_v15 = vcvt.s32.f32 %v1699_v11  ;;  %vm282_vm0 = vcmp.lt.f32.partialorder %v1848_v25, %v1815_v55  ;;  %v1279_v8 = vsel %vm2314_vm11, 1.0, %v1659_v52  ;;  %vm440_vm9 = vmand %vm2338_vm13, %vm1734_vm5 }
 0x4ec   :  { %1429 = vmatprep.subr.mxu0 %v2248_v36  ;;  %1460 = vmatprep.subr.mxu1 %v707_v29  ;;  %v500_v62 = vsel %vm1902_vm6, %v1295_v2, %v1895_v54  ;;  %v144_v1 = vadd.f32 %v143_v17, %v142_v46  ;;  %v1294_v25 = vsel %vm441_vm8, 1.0, %v1659_v52  ;;  %v2368_v20 = vsub.f32 %v2323_v57, %v2323_v57 }
 0x4ed   :  { %v333_v21 = vmin.f32 %v311_v4, %v1866_v34  ;;  %v714_v26 = vand.u32 4294901760, %v713_v33  ;;  %v720_v46 = vsub.f32 %v2285_v48, %v2326_v19  ;;  %v2374_v38 = vand.u32 4294901760, %v2330_v59 }
 0x4ee   :  { %vm354_vm4 = vcmp.eq.f32.partialorder %v1884_v50, %v1858_v30  ;;  %v2383_v18 = vsel %vm282_vm0, %v1279_v8, %v500_v62  ;;  %v310_v31 = vmax.f32 %v294_v44, 0.0  ;;  %v293_v2 = vsub.f32 %v2345_v15, %v1815_v55 }
 0x4ef   :  { %1430 = vmatpush3.xpose.msra.mxu0 %v2248_v36  ;;  %1461 = vmatpush3.xpose.msra.mxu1 %v707_v29  ;;  %vm2386_vm1 = vcmp.eq.f32.partialorder %v1887_v53, %v333_v21  ;;  %vm281_vm10 = vcmp.lt.f32.partialorder %v1850_v27, %v1815_v55  ;;  %v1278_v29 = vsel %vm2361_vm15, 1.0, %v1659_v52  ;;  %v499_v33 = vsel %vm1902_vm6, %v1294_v25, %v1895_v54  ;;  %vm2409_vm7 = vmand %vm354_vm4, %vm187_vm2 }
 0x4f0   :  { %1431 = vmatprep.subr.mxu0 %v2297_v24  ;;  %1462 = vmatprep.subr.mxu1 %v714_v26  ;;  %v145_v4 = vrot.slane %v144_v1, 1  ;;  %v2402_v44 = vand.u32 4294901760, %v2368_v20  ;;  %v1293_v27 = vsel %vm440_vm9, 1.0, %v1659_v52  ;;  %v332_v62 = vmin.f32 %v310_v31, %v1866_v34  ;;  %vm439_vm11 = vmand %vm2386_vm1, %vm1734_vm5 }
 0x4f1   :  { %v721_v11 = vand.u32 4294901760, %v720_v46  ;;  %v727_v25 = vsub.f32 %v2330_v59, %v2374_v38  ;;  %v2424_v21 = vsub.f32 %v2383_v18, %v2383_v18  ;;  %vm353_vm14 = vcmp.eq.f32.partialorder %v1884_v50, %v1868_v37 }
 0x4f2   :  { %v2433_v13 = vsel %vm281_vm10, %v1278_v29, %v499_v33  ;;  %vm2436_vm3 = vcmp.eq.f32.partialorder %v1887_v53, %v332_v62  ;;  %v309_v31 = vmax.f32 %v293_v2, 0.0  ;;  %vm280_vm8 = vcmp.lt.f32.partialorder %v1858_v30, %v1815_v55  ;;  %vm370_vm13 = vmand %vm353_vm14, %vm187_vm2 }
 0x4f3   :  { %1432 = vmatpush3.xpose.msra.mxu0 %v2297_v24  ;;  %1463 = vmatpush3.xpose.msra.mxu1 %v714_v26  ;;  %v1277_v17 = vsel %vm2409_vm7, 1.0, %v1659_v52  ;;  %v498_v26 = vsel %vm1902_vm6, %v1293_v27, %v1895_v54  ;;  %v146_v29 = vadd.f32 %v145_v4, %v144_v1  ;;  %v734_v33 = vsub.f32 %v2368_v20, %v2402_v44  ;;  %vm438_vm15 = vmand %vm2436_vm3, %vm1734_vm5 }
 0x4f4   :  { %1433 = vmatprep.subr.mxu0 %v2323_v57  ;;  %1464 = vmatprep.subr.mxu1 %v721_v11  ;;  %v1292_v2 = vsel %vm439_vm11, 1.0, %v1659_v52  ;;  %v331_v62 = vmin.f32 %v309_v31, %v1866_v34  ;;  %v728_v30 = vand.u32 4294901760, %v727_v25  ;;  %v2456_v7 = vand.u32 4294901760, %v2424_v21 }
 0x4f5   :  { %v2460_v8 = vsub.f32 %v2433_v13, %v2433_v13  ;;  %vm352_vm0 = vcmp.eq.f32.partialorder %v1884_v50, %v2203_v61  ;;  %v2469_v34 = vsel %vm280_vm8, %v1277_v17, %v498_v26  ;;  %v1276_v4 = vsel %vm370_vm13, 1.0, %v1659_v52 }
 0x4f6   :  { %vm2472_vm4 = vcmp.eq.f32.partialorder %v1887_v53, %v331_v62  ;;  %v497_v27 = vsel %vm1902_vm6, %v1292_v2, %v1895_v54  ;;  %v559_v25 = vadd.f32 1.0, %v146_v29  ;;  %v735_v46 = vand.u32 4294901760, %v734_v33  ;;  %vm369_vm1 = vmand %vm352_vm0, %vm187_vm2 }
 0x4f7   :  { %1434 = vmatpush3.xpose.msra.mxu0 %v2323_v57  ;;  %1465 = vmatpush3.xpose.msra.mxu1 %v721_v11  ;;  %vm279_vm9 = vcmp.lt.f32.partialorder %v1868_v37, %v1815_v55  ;;  %v1291_v53 = vsel %vm438_vm15, 1.0, %v1659_v52  ;;  %v741_v11 = vsub.f32 %v2424_v21, %v2456_v7  ;;  %v2489_v31 = vand.u32 4294901760, %v2460_v8  ;;  %vm437_vm7 = vmand %vm2472_vm4, %vm1734_vm5 }
 0x4f8   :  { %1435 = vmatprep.subr.mxu0 %v2383_v18  ;;  %1466 = vmatprep.subr.mxu1 %v728_v30  ;;  %v2493_v17 = vsub.f32 %v2469_v34, %v2469_v34  ;;  %vm351_vm10 = vcmp.eq.f32.partialorder %v1884_v50, %v2345_v15  ;;  %v2502_v37 = vsel %vm279_vm9, %v1276_v4, %v497_v27  ;;  %v1275_v26 = vsel %vm369_vm1, 1.0, %v1659_v52 }
 0x4f9   :  { %v496_v29 = vsel %vm1902_vm6, %v1291_v53, %v1895_v54  ;;  %vm2779_vm14 = vcmask 1040384   ;;  %vm278_vm11 = vcmp.lt.f32.partialorder %v2203_v61, %v1815_v55  ;;  %vm368_vm5 = vmand %vm351_vm10, %vm187_vm2  ;;  %v1290_v51 = vsel %vm437_vm7, 1.0, %v1659_v52 }
 0x4fa   :  { %v565_v50 = vsel %vm2779_vm14, %v559_v25, 0.0  ;;  %v742_v33 = vand.u32 4294901760, %v741_v11  ;;  %v748_v2 = vsub.f32 %v2460_v8, %v2489_v31  ;;  %v2518_v62 = vand.u32 4294901760, %v2493_v17 }
 0x4fb   :  { %1436 = vmatpush3.xpose.msra.mxu0 %v2383_v18  ;;  %1467 = vmatpush3.xpose.msra.mxu1 %v728_v30  ;;  %v2522_v30 = vsub.f32 %v2502_v37, %v2502_v37  ;;  %v2525_v61 = vsel %vm278_vm11, %v1275_v26, %v496_v29  ;;  %v2527_v49 = vand.u32 4294901760, %v565_v50  ;;  %v1274_v1 = vsel %vm368_vm5, 1.0, %v1659_v52 }
 0x4fc   :  { %1437 = vmatprep.subr.mxu0 %v2433_v13  ;;  %1468 = vmatprep.subr.mxu1 %v735_v46  ;;  %v495_v4 = vsel %vm1902_vm6, %v1290_v51, %v1895_v54  ;;  %vm277_vm2 = vcmp.lt.f32.partialorder %v2345_v15, %v1815_v55  ;;  %v749_v27 = vand.u32 4294901760, %v748_v2  ;;  %v755_v25 = vsub.f32 %v2493_v17, %v2518_v62 }
 0x4fd   :  { %v2543_v53 = vsub.f32 %v2525_v61, %v2525_v61  ;;  %v2546_v52 = vsel %vm277_vm2, %v1274_v1, %v495_v4  ;;  %v2550_v55 = vsub.f32 %v565_v50, %v2527_v49 }
 0x4fe   :  { %v756_v54 = vand.u32 4294901760, %v755_v25  ;;  %v2559_v11 = vsub.f32 %v2546_v52, %v2546_v52 }
 0x4ff   :  { %1438 = vmatpush3.xpose.msra.mxu0 %v2433_v13  ;;  %1469 = vmatpush3.xpose.msra.mxu1 %v735_v46  ;;  %v2539_v46 = vand.u32 4294901760, %v2522_v30  ;;  %v2555_v15 = vand.u32 4294901760, %v2543_v53  ;;  %v659_v26 = vand.u32 4294901760, %v2550_v55 }
 0x500   :  { %1439 = vmatprep.subr.mxu0 %v2469_v34  ;;  %1470 = vmatprep.subr.mxu1 %v742_v33  ;;  %v2567_v51 = vand.u32 4294901760, %v2559_v11 }
 0x501   :  { %v762_v16 = vsub.f32 %v2522_v30, %v2539_v46  ;;  %v769_v50 = vsub.f32 %v2543_v53, %v2555_v15 }
 0x502   :  { %v776_v1 = vsub.f32 %v2559_v11, %v2567_v51 }
 0x503   :  { %1440 = vmatpush3.xpose.msra.mxu0 %v2469_v34  ;;  %1471 = vmatpush3.xpose.msra.mxu1 %v742_v33  ;;  %v763_v29 = vand.u32 4294901760, %v762_v16  ;;  %v660_v33 = vsub.f32 %v2550_v55, %v659_v26  ;;  %v770_v2 = vand.u32 4294901760, %v769_v50 }
 0x504   :  { %1441 = vmatprep.subr.mxu0 %v2502_v37  ;;  %1472 = vmatprep.subr.mxu1 %v749_v27 }
 0x505   :  { %v661_v4 = vand.u32 4294901760, %v660_v33 }
 0x507   :  { %1442 = vmatpush3.xpose.msra.mxu0 %v2502_v37  ;;  %1473 = vmatpush3.xpose.msra.mxu1 %v749_v27  ;;  %v777_v27 = vand.u32 4294901760, %v776_v1 }
 0x508   :  { %1443 = vmatprep.subr.mxu0 %v2525_v61  ;;  %1474 = vmatprep.subr.mxu1 %v756_v54 }
 0x50b   :  { %1444 = vmatpush3.xpose.msra.mxu0 %v2525_v61  ;;  %1475 = vmatpush3.xpose.msra.mxu1 %v756_v54 }
 0x50c   :  { %1445 = vmatprep.subr.mxu0 %v2546_v52  ;;  %1476 = vmatprep.subr.mxu1 %v763_v29 }
 0x50f   :  { %1446 = vmatpush3.xpose.msra.mxu0 %v2546_v52  ;;  %1477 = vmatpush3.xpose.msra.mxu1 %v763_v29 }
 0x510   :  { %1478 = vmatprep.subr.mxu1 %v770_v2  ;;  %1485 = vmatprep.subr.mxu0 %v1991_v40 }
 0x512   :  { %1448 = vmatmul.mubr.f32.vlgmr.msra.gmra.mxu0 %v661_v4 }
 0x513   :  { %1479 = vmatpush3.xpose.msra.mxu1 %v770_v2  ;;  %1486 = vmatpush3.xpose.msra.mxu0 %v1991_v40  ;;  %v2780_v40 = vand.u32 4294901760, %v1772_v6 }
 0x514   :  { %1517 = vmatprep.mubr.f32.mxu0 %v1772_v6  ;;  %1480 = vmatprep.subr.mxu1 %v777_v27 }
 0x515   :  { %1487 = vmatprep.subr.mxu0 %v2030_v0 }
 0x517   :  { %1481 = vmatpush3.xpose.msra.mxu1 %v777_v27  ;;  %1488 = vmatpush3.xpose.msra.mxu0 %v2030_v0 }
 0x518   :  { %1489 = vmatprep.subr.mxu0 %v2072_v12  ;;  %1520 = vmatprep.subr.mxu1 %v1965_v32 }
 0x51a   :  { %1483 = vmatmul.mubr.f32.vlgmr.msra.gmra.mxu1 %v2527_v49 }
 0x51b   :  { %1490 = vmatpush3.xpose.msra.mxu0 %v2072_v12  ;;  %1521 = vmatpush3.xpose.msra.mxu1 %v1965_v32 }
 0x51c   :  { %1552 = vmatprep.mubr.f32.mxu1 %v2780_v40  ;;  %1491 = vmatprep.subr.mxu0 %v2106_v10 }
 0x51d   :  { %1522 = vmatprep.subr.mxu1 %v2001_v41 }
 0x51f   :  { %1492 = vmatpush3.xpose.msra.mxu0 %v2106_v10  ;;  %1523 = vmatpush3.xpose.msra.mxu1 %v2001_v41 }
 0x520   :  { %1493 = vmatprep.subr.mxu0 %v2126_v35  ;;  %1524 = vmatprep.subr.mxu1 %v2035_v45 }
 0x523   :  { %1494 = vmatpush3.xpose.msra.mxu0 %v2126_v35  ;;  %1525 = vmatpush3.xpose.msra.mxu1 %v2035_v45 }
 0x524   :  { %1495 = vmatprep.subr.mxu0 %v2176_v47  ;;  %1526 = vmatprep.subr.mxu1 %v2067_v63 }
 0x527   :  { %1496 = vmatpush3.xpose.msra.mxu0 %v2176_v47  ;;  %1527 = vmatpush3.xpose.msra.mxu1 %v2067_v63 }
 0x528   :  { %1497 = vmatprep.subr.mxu0 %v2245_v58  ;;  %1528 = vmatprep.subr.mxu1 %v2098_v14 }
 0x52b   :  { %1498 = vmatpush3.xpose.msra.mxu0 %v2245_v58  ;;  %1529 = vmatpush3.xpose.msra.mxu1 %v2098_v14 }
 0x52c   :  { %1499 = vmatprep.subr.mxu0 %v2285_v48  ;;  %1530 = vmatprep.subr.mxu1 %v2142_v42 }
 0x52f   :  { %1500 = vmatpush3.xpose.msra.mxu0 %v2285_v48  ;;  %1531 = vmatpush3.xpose.msra.mxu1 %v2142_v42 }
 0x530   :  { %1501 = vmatprep.subr.mxu0 %v2330_v59  ;;  %1532 = vmatprep.subr.mxu1 %v2195_v23 }
 0x533   :  { %1502 = vmatpush3.xpose.msra.mxu0 %v2330_v59  ;;  %1533 = vmatpush3.xpose.msra.mxu1 %v2195_v23 }
 0x534   :  { %1503 = vmatprep.subr.mxu0 %v2368_v20  ;;  %1534 = vmatprep.subr.mxu1 %v2248_v36 }
 0x537   :  { %1504 = vmatpush3.xpose.msra.mxu0 %v2368_v20  ;;  %1535 = vmatpush3.xpose.msra.mxu1 %v2248_v36 }
 0x538   :  { %1505 = vmatprep.subr.mxu0 %v2424_v21  ;;  %1536 = vmatprep.subr.mxu1 %v2297_v24 }
 0x53b   :  { %1506 = vmatpush3.xpose.msra.mxu0 %v2424_v21  ;;  %1537 = vmatpush3.xpose.msra.mxu1 %v2297_v24 }
 0x53c   :  { %1507 = vmatprep.subr.mxu0 %v2460_v8  ;;  %1538 = vmatprep.subr.mxu1 %v2323_v57 }
 0x53f   :  { %1508 = vmatpush3.xpose.msra.mxu0 %v2460_v8  ;;  %1539 = vmatpush3.xpose.msra.mxu1 %v2323_v57 }
 0x540   :  { %1509 = vmatprep.subr.mxu0 %v2493_v17  ;;  %1540 = vmatprep.subr.mxu1 %v2383_v18 }
 0x543   :  { %1510 = vmatpush3.xpose.msra.mxu0 %v2493_v17  ;;  %1541 = vmatpush3.xpose.msra.mxu1 %v2383_v18 }
 0x544   :  { %1511 = vmatprep.subr.mxu0 %v2522_v30  ;;  %1542 = vmatprep.subr.mxu1 %v2433_v13 }
 0x547   :  { %1512 = vmatpush3.xpose.msra.mxu0 %v2522_v30  ;;  %1543 = vmatpush3.xpose.msra.mxu1 %v2433_v13 }
 0x548   :  { %1513 = vmatprep.subr.mxu0 %v2543_v53  ;;  %1544 = vmatprep.subr.mxu1 %v2469_v34 }
 0x54b   :  { %1514 = vmatpush3.xpose.msra.mxu0 %v2543_v53  ;;  %1545 = vmatpush3.xpose.msra.mxu1 %v2469_v34 }
 0x54c   :  { %1515 = vmatprep.subr.mxu0 %v2559_v11  ;;  %1546 = vmatprep.subr.mxu1 %v2502_v37 }
 0x54f   :  { %1516 = vmatpush3.xpose.msra.mxu0 %v2559_v11  ;;  %1547 = vmatpush3.xpose.msra.mxu1 %v2502_v37 }
 0x550   :  { %1548 = vmatprep.subr.mxu1 %v2525_v61  ;;  %1555 = vmatprep.subr.mxu0 %v2021_v43 }
 0x552   :  { %1518 = vmatmul.mubr.f32.vlgmr.msra.gmra.mxu0 %v2550_v55 }
 0x553   :  { %1549 = vmatpush3.xpose.msra.mxu1 %v2525_v61  ;;  %1556 = vmatpush3.xpose.msra.mxu0 %v2021_v43 }
 0x554   :  { %1587 = vmatprep.mubr.f32.mxu0 %v1768_v5  ;;  %1550 = vmatprep.subr.mxu1 %v2546_v52 }
 0x555   :  { %1557 = vmatprep.subr.mxu0 %v2056_v56 }
 0x557   :  { %1551 = vmatpush3.xpose.msra.mxu1 %v2546_v52  ;;  %1558 = vmatpush3.xpose.msra.mxu0 %v2056_v56 }
 0x558   :  { %1559 = vmatprep.subr.mxu0 %v2101_v28  ;;  %1590 = vmatprep.subr.mxu1 %v1965_v32 }
 0x55a   :  { %1553 = vmatmul.mubr.f32.vlgmr.msra.gmra.mxu1 %v659_v26 }
 0x55b   :  { %1560 = vmatpush3.xpose.msra.mxu0 %v2101_v28  ;;  %1591 = vmatpush3.xpose.msra.mxu1 %v1965_v32 }
 0x55c   :  { %1622 = vmatprep.mubr.f32.mxu1 %v1768_v5  ;;  %1561 = vmatprep.subr.mxu0 %v2145_v3 }
 0x55d   :  { %1592 = vmatprep.subr.mxu1 %v2001_v41 }
 0x55f   :  { %1562 = vmatpush3.xpose.msra.mxu0 %v2145_v3  ;;  %1593 = vmatpush3.xpose.msra.mxu1 %v2001_v41 }
 0x560   :  { %1563 = vmatprep.subr.mxu0 %v2183_v60  ;;  %1594 = vmatprep.subr.mxu1 %v2035_v45 }
 0x563   :  { %1564 = vmatpush3.xpose.msra.mxu0 %v2183_v60  ;;  %1595 = vmatpush3.xpose.msra.mxu1 %v2035_v45 }
 0x564   :  { %1565 = vmatprep.subr.mxu0 %v2224_v9  ;;  %1596 = vmatprep.subr.mxu1 %v2067_v63 }
 0x567   :  { %1566 = vmatpush3.xpose.msra.mxu0 %v2224_v9  ;;  %1597 = vmatpush3.xpose.msra.mxu1 %v2067_v63 }
 0x568   :  { %1567 = vmatprep.subr.mxu0 %v2281_v22  ;;  %1598 = vmatprep.subr.mxu1 %v2098_v14 }
 0x56b   :  { %1568 = vmatpush3.xpose.msra.mxu0 %v2281_v22  ;;  %1599 = vmatpush3.xpose.msra.mxu1 %v2098_v14 }
 0x56c   :  { %1569 = vmatprep.subr.mxu0 %v2326_v19  ;;  %1600 = vmatprep.subr.mxu1 %v2142_v42 }
 0x56f   :  { %1570 = vmatpush3.xpose.msra.mxu0 %v2326_v19  ;;  %1601 = vmatpush3.xpose.msra.mxu1 %v2142_v42 }
 0x570   :  { %1571 = vmatprep.subr.mxu0 %v2374_v38  ;;  %1602 = vmatprep.subr.mxu1 %v2195_v23 }
 0x573   :  { %1572 = vmatpush3.xpose.msra.mxu0 %v2374_v38  ;;  %1603 = vmatpush3.xpose.msra.mxu1 %v2195_v23 }
 0x574   :  { %1573 = vmatprep.subr.mxu0 %v2402_v44  ;;  %1604 = vmatprep.subr.mxu1 %v2248_v36 }
 0x577   :  { %1574 = vmatpush3.xpose.msra.mxu0 %v2402_v44  ;;  %1605 = vmatpush3.xpose.msra.mxu1 %v2248_v36 }
 0x578   :  { %1575 = vmatprep.subr.mxu0 %v2456_v7  ;;  %1606 = vmatprep.subr.mxu1 %v2297_v24 }
 0x57b   :  { %1576 = vmatpush3.xpose.msra.mxu0 %v2456_v7  ;;  %1607 = vmatpush3.xpose.msra.mxu1 %v2297_v24 }
 0x57c   :  { %1577 = vmatprep.subr.mxu0 %v2489_v31  ;;  %1608 = vmatprep.subr.mxu1 %v2323_v57 }
 0x57f   :  { %1578 = vmatpush3.xpose.msra.mxu0 %v2489_v31  ;;  %1609 = vmatpush3.xpose.msra.mxu1 %v2323_v57 }
 0x580   :  { %1579 = vmatprep.subr.mxu0 %v2518_v62  ;;  %1610 = vmatprep.subr.mxu1 %v2383_v18 }
 0x583   :  { %1580 = vmatpush3.xpose.msra.mxu0 %v2518_v62  ;;  %1611 = vmatpush3.xpose.msra.mxu1 %v2383_v18 }
 0x584   :  { %1581 = vmatprep.subr.mxu0 %v2539_v46  ;;  %1612 = vmatprep.subr.mxu1 %v2433_v13 }
 0x587   :  { %1582 = vmatpush3.xpose.msra.mxu0 %v2539_v46  ;;  %1613 = vmatpush3.xpose.msra.mxu1 %v2433_v13 }
 0x588   :  { %1583 = vmatprep.subr.mxu0 %v2555_v15  ;;  %1614 = vmatprep.subr.mxu1 %v2469_v34 }
 0x58b   :  { %1584 = vmatpush3.xpose.msra.mxu0 %v2555_v15  ;;  %1615 = vmatpush3.xpose.msra.mxu1 %v2469_v34 }
 0x58c   :  { %1585 = vmatprep.subr.mxu0 %v2567_v51  ;;  %1616 = vmatprep.subr.mxu1 %v2502_v37 }
 0x58f   :  { %1586 = vmatpush3.xpose.msra.mxu0 %v2567_v51  ;;  %1617 = vmatpush3.xpose.msra.mxu1 %v2502_v37 }
 0x590   :  { %1618 = vmatprep.subr.mxu1 %v2525_v61 }
 0x592   :  { %1588 = vmatmul.mubr.f32.vlgmr.msra.gmra.mxu0 %v2527_v49 }
 0x593   :  { %1619 = vmatpush3.xpose.msra.mxu1 %v2525_v61 }
 0x594   :  { %1620 = vmatprep.subr.mxu1 %v2546_v52 }
 0x597   :  { %1621 = vmatpush3.xpose.msra.mxu1 %v2546_v52 }
 0x59a   :  { %1623 = vmatmul.mubr.f32.vlgmr.msra.gmra.mxu1 %v2527_v49 }
 0x5d2   :  { %v1449_v5 = vpop.f32.mrf.mxu0 }
 0x5d4   :  { %v653_v6 = vpop.f32.mrf.mxu0 }
 0x5da   :  { %v1484_v7 = vpop.f32.mrf.mxu1 }
 0x5db   :  { %v821_v45 = vadd.f32 %v1484_v7, %v1449_v5 }
 0x5dc   :  { %v814_v41 = vpop.f32.mrf.mxu1 }
 0x5dd   :  { %v815_v63 = vadd.f32 %v814_v41, %v653_v6 }
 0x612   :  { %v1519_v32 = vpop.f32.mrf.mxu0 }
 0x613   :  { %v932_v12 = vadd.f32 %v1519_v32, %v821_v45 }
 0x614   :  { %v924_v43 = vpop.f32.mrf.mxu0 }
 0x615   :  { %v925_v28 = vadd.f32 %v924_v43, %v815_v63 }
 0x61a   :  { %v1554_v0 = vpop.f32.mrf.mxu1 }
 0x61b   :  { %v1029_v10 = vadd.f32 %v1554_v0, %v932_v12 }
 0x61c   :  { %v1020_v14 = vpop.f32.mrf.mxu1 }
 0x61d   :  { %v1021_v42 = vadd.f32 %v1020_v14, %v925_v28 }
 0x652   :  { %v1589_v56 = vpop.f32.mrf.mxu0 }
 0x653   :  { %v1154_v3 = vadd.f32 %v1589_v56, %v1029_v10 }
 0x654   :  { %v1147_v35 = vpop.f32.mrf.mxu0 }
 0x655   :  { %v1148_v60 = vadd.f32 %v1147_v35, %v1021_v42 }
 0x65a   :  { %v1624_v47 = vpop.f32.mrf.mxu1 }
 0x65b   :  { %v1247_v23 = vadd.f32 %v1624_v47, %v1154_v3 }
 0x65c   :  { %v1240_v9 = vpop.f32.mrf.mxu1 }
 0x65d   :  { %v1263_v58 = vsel %vm1799_vm12, 0.0, %v1247_v23  ;;  %v1241_v36 = vadd.f32 %v1240_v9, %v1148_v60 }
 0x65e   :  { %1265 = vst [vmem:[%s2726_s2 + $0x8] sm:$0xff] %v1263_v58 }
 0x65f   :  { %1264 = vst [vmem:[%s2726_s2] sm:$0xff] %v1241_v36 }

</bundles_post_ra>
